<compile_context>
chip_gen: v7x
topology: tpu7x:2x2x1
jax: 0.10.0
libtpu: 0.0.40
codegen_flags: <defaults>
</compile_context>

<pallas_src>
import functools

import jax
import jax.numpy as jnp
from jax.experimental import pallas as pl
from jax.experimental.pallas import tpu as pltpu

LANE = 128   # pixel tile (lane axis) for the transposed GEMM
KPAD = 16    # contraction-dim padding (bf16 sublane packing friendly)
CPAD = 8     # output-channel (sublane) padding


def _round_up(x, m):
    return ((x + m - 1) // m) * m


# ---------------------------------------------------------------------------
# Pallas kernels
# ---------------------------------------------------------------------------
def _gemm_bias_kernel(w_ref, a_ref, bias_ref, o_ref, *, relu):
    # out(Cout_p, LANE) = W(Cout_p, Kp) @ A(Kp, LANE); pixels on the lane axis.
    r = jnp.dot(w_ref[...], a_ref[...], preferred_element_type=jnp.float32)
    r = r + bias_ref[...]                      # (Cout_p, 1) lane-broadcast
    if relu:
        r = jnp.maximum(r, 0.0)
    o_ref[...] = r


def _avgpool_kernel(a_ref, b_ref, c_ref, d_ref, o_ref):
    o_ref[...] = 0.25 * (a_ref[...] + b_ref[...] + c_ref[...] + d_ref[...])


def _blend_kernel(w0_ref, w1_ref, m0_ref, m1_ref, o_ref, *, t):
    # metrics are (N,1,HW): sigmoid computed once per pixel, broadcast across
    # channels (sublane broadcast) inside the kernel.
    a0 = (1.0 - t) * jax.nn.sigmoid(m0_ref[...])
    a1 = t * jax.nn.sigmoid(m1_ref[...])
    o_ref[...] = (a0 * w0_ref[...] + a1 * w1_ref[...]) / (a0 + a1 + 1e-6)


# ---------------------------------------------------------------------------
# Ops built on the kernels
# ---------------------------------------------------------------------------
def gemm_bias_t(wm, a, bias, relu=False):
    """out = wm(Cp,Kp)[bf16] @ a(K,M)[->bf16] + bias(Cp,1)[f32], f32 accumulate.

    Pixels (M) land on the lane axis -> lane-dense stores; Cout pads to 8 only.
    Full-K block: no K grid axis, no accumulator scratch.
    """
    Cp, Kp = wm.shape
    K, M = a.shape
    Mp = _round_up(M, LANE)
    a_p = jnp.pad(a.astype(jnp.bfloat16), ((0, Kp - K), (0, Mp - M)))

    out = pl.pallas_call(
        functools.partial(_gemm_bias_kernel, relu=relu),
        out_shape=jax.ShapeDtypeStruct((Cp, Mp), jnp.float32),
        grid_spec=pltpu.PrefetchScalarGridSpec(
            num_scalar_prefetch=0,
            grid=(Mp // LANE,),
            in_specs=[
                pl.BlockSpec((Cp, Kp), lambda i: (0, 0)),      # weights
                pl.BlockSpec((Kp, LANE), lambda i: (0, i)),    # im2col patches^T
                pl.BlockSpec((Cp, 1), lambda i: (0, 0)),       # bias
            ],
            out_specs=pl.BlockSpec((Cp, LANE), lambda i: (0, i)),
        ),
        compiler_params=pltpu.CompilerParams(
            dimension_semantics=("parallel",)),
    )(wm, a_p, bias)
    return out[:, :M]


def conv2d(x, lp, *, cout, k, stride=1, relu=True):
    """NCHW 'same' conv: im2col (XLA glue) + transposed Pallas GEMM (MXU)."""
    N, C, H, W = x.shape
    ph = pw = k // 2
    xp = jnp.pad(x, ((0, 0), (0, 0), (ph, ph), (pw, pw)))
    Ho = (H + 2 * ph - k) // stride + 1
    Wo = (W + 2 * pw - k) // stride + 1
    cols = []
    for i in range(k):
        for j in range(k):
            cols.append(xp[:, :, i:i + stride * Ho:stride,
                           j:j + stride * Wo:stride])
    patches = jnp.stack(cols, axis=2)                 # (N, C, k*k, Ho, Wo)
    # rows ordered (cin, ki, kj) to match w.reshape(Cout, Cin*k*k)
    a = patches.transpose(1, 2, 0, 3, 4).reshape(C * k * k, N * Ho * Wo)
    out = gemm_bias_t(lp['wm'], a, lp['bias'], relu=relu)   # (Cout_p, M)
    return out[:cout].reshape(cout, N, Ho, Wo).transpose(1, 0, 2, 3)


def downsample_half(x):
    """F.interpolate(scale_factor=0.5, bilinear, align_corners=False)
    == exact 2x2 average pooling when H, W are even (Pallas elementwise)."""
    N, C, H, W = x.shape
    assert H % 2 == 0 and W % 2 == 0, "bilinear-0.5 == avgpool only for even H/W"
    Hh, Wh = H // 2, W // 2
    a = x[:, :, 0::2, 0::2].reshape(N * C, Hh * Wh)
    b = x[:, :, 0::2, 1::2].reshape(N * C, Hh * Wh)
    c = x[:, :, 1::2, 0::2].reshape(N * C, Hh * Wh)
    d = x[:, :, 1::2, 1::2].reshape(N * C, Hh * Wh)
    out = pl.pallas_call(
        _avgpool_kernel,
        out_shape=jax.ShapeDtypeStruct(a.shape, jnp.float32),
    )(a, b, c, d)
    return out.reshape(N, C, Hh, Wh)


def metric_blend(warp0, warp1, metric0, metric1, t):
    N, C, H, W = warp0.shape
    w0 = warp0.reshape(N, C, H * W)
    w1 = warp1.reshape(N, C, H * W)
    m0 = metric0.reshape(N, 1, H * W)
    m1 = metric1.reshape(N, 1, H * W)
    out = pl.pallas_call(
        functools.partial(_blend_kernel, t=t),
        out_shape=jax.ShapeDtypeStruct((N, C, H * W), jnp.float32),
    )(w0, w1, m0, m1)
    return out.reshape(N, C, H, W)


def backwarp(img, flow):
    # TODO(synk): bilinear grid_sample-style gather kept in plain JAX —
    # data-dependent gather has no clean rectangular-BlockSpec Pallas mapping.
    N, C, H, W = img.shape
    gy, gx = jnp.meshgrid(jnp.arange(H, dtype=jnp.float32),
                          jnp.arange(W, dtype=jnp.float32), indexing='ij')
    x = gx[None] + flow[:, 0]
    y = gy[None] + flow[:, 1]
    x0 = jnp.floor(x)
    y0 = jnp.floor(y)
    wx = (x - x0)[..., None]
    wy = (y - y0)[..., None]
    x0i = x0.astype(jnp.int32)
    y0i = y0.astype(jnp.int32)
    bidx = jnp.arange(N)[:, None, None]

    def gather(yi, xi):
        # grid_sample padding_mode='zeros': out-of-frame corners contribute 0.
        valid = ((yi >= 0) & (yi < H) & (xi >= 0) & (xi < W))
        yi_c = jnp.clip(yi, 0, H - 1)
        xi_c = jnp.clip(xi, 0, W - 1)
        v = img[bidx, :, yi_c, xi_c]                   # (N, H, W, C)
        return v * valid[..., None].astype(v.dtype)

    v00 = gather(y0i, x0i)
    v01 = gather(y0i, x0i + 1)
    v10 = gather(y0i + 1, x0i)
    v11 = gather(y0i + 1, x0i + 1)
    out = (v00 * (1 - wx) * (1 - wy) + v01 * wx * (1 - wy)
           + v10 * (1 - wx) * wy + v11 * wx * wy)
    return out.transpose(0, 3, 1, 2)


def upsample2_bilinear(x):
    N, C, H, W = x.shape
    return jax.image.resize(x, (N, C, 2 * H, 2 * W), method='bilinear')


# ---------------------------------------------------------------------------
# Synthetic sub-networks (deterministic weights; real checkpoints unavailable)
# ---------------------------------------------------------------------------
def init_params(key):
    """Weights are prepped once into the GEMM-ready layout:
    wm: (round_up(Cout,8), round_up(Cin*k*k,16)) in bf16; bias: (Cout_p, 1) f32."""
    def conv_p(k_, cout, cin, ksz):
        kw_, kb_ = jax.random.split(k_)
        w = 0.1 * jax.random.normal(kw_, (cout, cin, ksz, ksz), jnp.float32)
        b = 0.01 * jax.random.normal(kb_, (cout,), jnp.float32)
        K = cin * ksz * ksz
        Kp = _round_up(K, KPAD)
        Cp = _round_up(cout, CPAD)
        wm = jnp.zeros((Cp, Kp), jnp.float32).at[:cout, :K].set(
            w.reshape(cout, K))
        bias = jnp.zeros((Cp, 1), jnp.float32).at[:cout, 0].set(b)
        return {'wm': wm.astype(jnp.bfloat16), 'bias': bias}

    keys = jax.random.split(key, 9)
    return {
        'feat1': conv_p(keys[0], 16, 3, 3),
        'feat2': conv_p(keys[1], 32, 16, 3),
        'feat3': conv_p(keys[2], 48, 32, 3),
        'flow1': conv_p(keys[3], 32, 6, 3),
        'flow2': conv_p(keys[4], 32, 32, 3),
        'flow3': conv_p(keys[5], 2, 32, 3),
        'metric1': conv_p(keys[6], 32, 10, 3),
        'metric2': conv_p(keys[7], 2, 32, 1),
        'fuse': conv_p(keys[8], 3, 9, 3),
    }


def feat_ext(p, img):
    f1 = conv2d(img, p['feat1'], cout=16, k=3, stride=2, relu=True)
    f2 = conv2d(f1, p['feat2'], cout=32, k=3, stride=2, relu=True)
    f3 = conv2d(f2, p['feat3'], cout=48, k=3, stride=2, relu=True)
    return f1, f2, f3


def flownet(p, x):
    # TODO(synk): GMFlow transformer/correlation stack replaced by a small
    # conv flow head with the same I/O contract (2-channel flow at input res).
    x = conv2d(x, p['flow1'], cout=32, k=3, relu=True)
    x = conv2d(x, p['flow2'], cout=32, k=3, relu=True)
    return conv2d(x, p['flow3'], cout=2, k=3, relu=False)


def metricnet(p, img0, img1, flow01, flow10):
    x = jnp.concatenate([img0, img1, flow01, flow10], axis=1)    # 10 channels
    x = conv2d(x, p['metric1'], cout=32, k=3, relu=True)
    x = conv2d(x, p['metric2'], cout=2, k=1, relu=False)
    return x[:, :1], x[:, 1:2]


def fusionnet(p, img0, img1, reuse_things, t):
    flow01, flow10, metric0, metric1, _feat0, _feat1 = reuse_things
    # flows/metrics were computed at half resolution -> bring to full res.
    f01 = upsample2_bilinear(flow01) * 2.0
    f10 = upsample2_bilinear(flow10) * 2.0
    m0 = upsample2_bilinear(metric0)
    m1 = upsample2_bilinear(metric1)
    warp0 = backwarp(img0, t * f01)
    warp1 = backwarp(img1, (1.0 - t) * f10)
    blended = metric_blend(warp0, warp1, m0, m1, t)       # Pallas elementwise
    # TODO(synk): full AnimeInterp GridNet synthesis over warped pyramid
    # features is reduced to a single residual refinement conv.
    res = conv2d(jnp.concatenate([blended, warp0, warp1], axis=1),
                 p['fuse'], cout=3, k=3, relu=False)
    return blended + res


def model_forward(p, x2):
    N = x2.shape[0]
    half = x2.shape[3] // 2
    img1 = x2[:, :, :, :half]          # torch.split: first chunk
    img0 = x2[:, :, :, half:]          # second chunk
    img1_, img2_ = img0, img1

    # Batched feature extraction (one conv stack for both images).
    imgs = jnp.concatenate([img0, img1], axis=0)                 # (2N,3,H,W)
    f1, f2, f3 = feat_ext(p, imgs)
    feat_ext0 = (f1[:N], f2[:N], f3[:N])
    feat_ext1 = (f1[N:], f2[N:], f3[N:])

    # Batched 0.5x downsample (Pallas avg-pool == bilinear 0.5).
    imgs_d = downsample_half(imgs)
    img0_d, img1_d = imgs_d[:N], imgs_d[N:]

    # Batched bidirectional flow (both directions in one flownet pass).
    fl_in = jnp.concatenate(
        [jnp.concatenate([img0_d, img1_d], axis=1),
         jnp.concatenate([img1_d, img0_d], axis=1)], axis=0)     # (2N,6,h,w)
    flows = flownet(p, fl_in)
    flow01, flow10 = flows[:N], flows[N:]

    metric0, metric1 = metricnet(p, img0_d, img1_d, flow01, flow10)
    reuse_things = (flow01, flow10, metric0, metric1, feat_ext0, feat_ext1)
    out = fusionnet(p, img1_, img2_, reuse_things, 0.5)
    # torch.nn.ZeroPad2d([0, topad]) pads the right side of the width axis.
    out = jnp.pad(out, ((0, 0), (0, 0), (0, 0), (0, half)))
    return out


if __name__ == "__main__":
    key = jax.random.PRNGKey(0)
    kx, kp = jax.random.split(key)
    x2 = jax.random.normal(kx, (2, 3, 16, 32), jnp.float32)   # NCHW
    params = init_params(kp)
    out = jax.jit(model_forward)(params, x2)
    out = jax.block_until_ready(out)
    assert out.shape == (2, 3, 16, 32), out.shape
    assert bool(jnp.all(jnp.isfinite(out)))
    print("KERNEL_OK")
</pallas_src>

<mosaic_0001>
module attributes {stable_mosaic.version = 11 : i64} {
  func.func @_avgpool_kernel(%arg0: memref<12x64xf32, #tpu.memory_space<vmem>>, %arg1: memref<12x64xf32, #tpu.memory_space<vmem>>, %arg2: memref<12x64xf32, #tpu.memory_space<vmem>>, %arg3: memref<12x64xf32, #tpu.memory_space<vmem>>, %arg4: memref<12x64xf32, #tpu.memory_space<vmem>>) attributes {dimension_semantics = [], scalar_prefetch = 0 : i64, scratch_operands = 0 : i64, tpu.core_type = #tpu.core_type<tc>} {
    %c0 = arith.constant 0 : index
    %c0_0 = arith.constant 0 : index
    %0 = vector.load %arg0[%c0, %c0_0] : memref<12x64xf32, #tpu.memory_space<vmem>>, vector<12x64xf32>
    %c0_1 = arith.constant 0 : index
    %c0_2 = arith.constant 0 : index
    %1 = vector.load %arg1[%c0_1, %c0_2] : memref<12x64xf32, #tpu.memory_space<vmem>>, vector<12x64xf32>
    %2 = arith.addf %0, %1 : vector<12x64xf32>
    %c0_3 = arith.constant 0 : index
    %c0_4 = arith.constant 0 : index
    %3 = vector.load %arg2[%c0_3, %c0_4] : memref<12x64xf32, #tpu.memory_space<vmem>>, vector<12x64xf32>
    %4 = arith.addf %2, %3 : vector<12x64xf32>
    %c0_5 = arith.constant 0 : index
    %c0_6 = arith.constant 0 : index
    %5 = vector.load %arg3[%c0_5, %c0_6] : memref<12x64xf32, #tpu.memory_space<vmem>>, vector<12x64xf32>
    %6 = arith.addf %4, %5 : vector<12x64xf32>
    %cst = arith.constant 2.500000e-01 : f32
    %7 = vector.broadcast %cst : f32 to vector<12x64xf32>
    %8 = arith.mulf %7, %6 : vector<12x64xf32>
    %c0_7 = arith.constant 0 : index
    %c0_8 = arith.constant 0 : index
    %9 = vector.load %arg4[%c0_7, %c0_8] : memref<12x64xf32, #tpu.memory_space<vmem>>, vector<12x64xf32>
    tpu.vector_store %arg4[%c0_7, %c0_8], %8 {strides = array<i32>} : memref<12x64xf32, #tpu.memory_space<vmem>>, vector<12x64xf32>,
    return
  }
}

module attributes {stable_mosaic.version = 11 : i64} {
  func.func @_gemm_bias_kernel(%arg0: i32, %arg1: memref<32x64xbf16, #tpu.memory_space<vmem>>, %arg2: memref<64x128xbf16, #tpu.memory_space<vmem>>, %arg3: memref<32x1xf32, #tpu.memory_space<vmem>>, %arg4: memref<32x128xf32, #tpu.memory_space<vmem>>) attributes {dimension_semantics = [#tpu.dimension_semantics<parallel>], iteration_bounds = array<i64: 2>, scalar_prefetch = 0 : i64, scratch_operands = 0 : i64, tpu.core_type = #tpu.core_type<tc>, window_params = [{pipeline_mode = #tpu.pipeline_mode<synchronous>, transform_indices = @transform_0, window_bounds = array<i64: 32, 64>}, {transform_indices = @transform_1, window_bounds = array<i64: 64, 128>}, {pipeline_mode = #tpu.pipeline_mode<synchronous>, transform_indices = @transform_2, window_bounds = array<i64: 32, 1>}, {transform_indices = @transform_3, window_bounds = array<i64: 32, 128>}]} {
    %c0 = arith.constant 0 : index
    %c0_0 = arith.constant 0 : index
    %0 = vector.load %arg1[%c0, %c0_0] : memref<32x64xbf16, #tpu.memory_space<vmem>>, vector<32x64xbf16>
    %c0_1 = arith.constant 0 : index
    %c0_2 = arith.constant 0 : index
    %1 = vector.load %arg2[%c0_1, %c0_2] : memref<64x128xbf16, #tpu.memory_space<vmem>>, vector<64x128xbf16>
    %cst = arith.constant dense<0.000000e+00> : vector<32x128xf32>
    %2 = tpu.matmul %0, %1, %cst {dimension_numbers = #tpu.dot_dimension_numbers<[1], [0], [0], [1], [0, 0, 1, 1], [], []>} : vector<32x64xbf16>, vector<64x128xbf16>, vector<32x128xf32> -> vector<32x128xf32>
    %c0_3 = arith.constant 0 : index
    %c0_4 = arith.constant 0 : index
    %3 = vector.load %arg3[%c0_3, %c0_4] : memref<32x1xf32, #tpu.memory_space<vmem>>, vector<32x1xf32>
    %4 = vector.broadcast %3 : vector<32x1xf32> to vector<32x128xf32>
    %5 = arith.addf %2, %4 : vector<32x128xf32>
    %cst_5 = arith.constant 0.000000e+00 : f32
    %6 = vector.broadcast %cst_5 : f32 to vector<32x128xf32>
    %7 = arith.maximumf %5, %6 : vector<32x128xf32>
    %c0_6 = arith.constant 0 : index
    %c0_7 = arith.constant 0 : index
    %8 = vector.load %arg4[%c0_6, %c0_7] : memref<32x128xf32, #tpu.memory_space<vmem>>, vector<32x128xf32>
    tpu.vector_store %arg4[%c0_6, %c0_7], %7 {strides = array<i32>} : memref<32x128xf32, #tpu.memory_space<vmem>>, vector<32x128xf32>,
    return
  }
  func.func @transform_0(%arg0: i32) -> (i32, i32) {
    %c0_i32 = arith.constant 0 : i32
    %c0_i32_0 = arith.constant 0 : i32
    %c0_i32_1 = arith.constant 0 : i32
    return %c0_i32, %c0_i32_0 : i32, i32
  }
  func.func @transform_1(%arg0: i32) -> (i32, i32) {
    %c0_i32 = arith.constant 0 : i32
    %c0_i32_0 = arith.constant 0 : i32
    return %c0_i32, %arg0 : i32, i32
  }
  func.func @transform_2(%arg0: i32) -> (i32, i32) {
    %c0_i32 = arith.constant 0 : i32
    %c0_i32_0 = arith.constant 0 : i32
    %c0_i32_1 = arith.constant 0 : i32
    return %c0_i32, %c0_i32_0 : i32, i32
  }
  func.func @transform_3(%arg0: i32) -> (i32, i32) {
    %c0_i32 = arith.constant 0 : i32
    %c0_i32_0 = arith.constant 0 : i32
    return %c0_i32, %arg0 : i32, i32
  }
}

module attributes {stable_mosaic.version = 11 : i64} {
  func.func @_gemm_bias_kernel(%arg0: i32, %arg1: memref<32x288xbf16, #tpu.memory_space<vmem>>, %arg2: memref<288x128xbf16, #tpu.memory_space<vmem>>, %arg3: memref<32x1xf32, #tpu.memory_space<vmem>>, %arg4: memref<32x128xf32, #tpu.memory_space<vmem>>) attributes {dimension_semantics = [#tpu.dimension_semantics<parallel>], iteration_bounds = array<i64: 2>, scalar_prefetch = 0 : i64, scratch_operands = 0 : i64, tpu.core_type = #tpu.core_type<tc>, window_params = [{pipeline_mode = #tpu.pipeline_mode<synchronous>, transform_indices = @transform_0, window_bounds = array<i64: 32, 288>}, {transform_indices = @transform_1, window_bounds = array<i64: 288, 128>}, {pipeline_mode = #tpu.pipeline_mode<synchronous>, transform_indices = @transform_2, window_bounds = array<i64: 32, 1>}, {transform_indices = @transform_3, window_bounds = array<i64: 32, 128>}]} {
    %c0 = arith.constant 0 : index
    %c0_0 = arith.constant 0 : index
    %0 = vector.load %arg1[%c0, %c0_0] : memref<32x288xbf16, #tpu.memory_space<vmem>>, vector<32x288xbf16>
    %c0_1 = arith.constant 0 : index
    %c0_2 = arith.constant 0 : index
    %1 = vector.load %arg2[%c0_1, %c0_2] : memref<288x128xbf16, #tpu.memory_space<vmem>>, vector<288x128xbf16>
    %cst = arith.constant dense<0.000000e+00> : vector<32x128xf32>
    %2 = tpu.matmul %0, %1, %cst {dimension_numbers = #tpu.dot_dimension_numbers<[1], [0], [0], [1], [0, 0, 1, 1], [], []>} : vector<32x288xbf16>, vector<288x128xbf16>, vector<32x128xf32> -> vector<32x128xf32>
    %c0_3 = arith.constant 0 : index
    %c0_4 = arith.constant 0 : index
    %3 = vector.load %arg3[%c0_3, %c0_4] : memref<32x1xf32, #tpu.memory_space<vmem>>, vector<32x1xf32>
    %4 = vector.broadcast %3 : vector<32x1xf32> to vector<32x128xf32>
    %5 = arith.addf %2, %4 : vector<32x128xf32>
    %cst_5 = arith.constant 0.000000e+00 : f32
    %6 = vector.broadcast %cst_5 : f32 to vector<32x128xf32>
    %7 = arith.maximumf %5, %6 : vector<32x128xf32>
    %c0_6 = arith.constant 0 : index
    %c0_7 = arith.constant 0 : index
    %8 = vector.load %arg4[%c0_6, %c0_7] : memref<32x128xf32, #tpu.memory_space<vmem>>, vector<32x128xf32>
    tpu.vector_store %arg4[%c0_6, %c0_7], %7 {strides = array<i32>} : memref<32x128xf32, #tpu.memory_space<vmem>>, vector<32x128xf32>,
    return
  }
  func.func @transform_0(%arg0: i32) -> (i32, i32) {
    %c0_i32 = arith.constant 0 : i32
    %c0_i32_0 = arith.constant 0 : i32
    %c0_i32_1 = arith.constant 0 : i32
    return %c0_i32, %c0_i32_0 : i32, i32
  }
  func.func @transform_1(%arg0: i32) -> (i32, i32) {
    %c0_i32 = arith.constant 0 : i32
    %c0_i32_0 = arith.constant 0 : i32
    return %c0_i32, %arg0 : i32, i32
  }
  func.func @transform_2(%arg0: i32) -> (i32, i32) {
    %c0_i32 = arith.constant 0 : i32
    %c0_i32_0 = arith.constant 0 : i32
    %c0_i32_1 = arith.constant 0 : i32
    return %c0_i32, %c0_i32_0 : i32, i32
  }
  func.func @transform_3(%arg0: i32) -> (i32, i32) {
    %c0_i32 = arith.constant 0 : i32
    %c0_i32_0 = arith.constant 0 : i32
    return %c0_i32, %arg0 : i32, i32
  }
}

module attributes {stable_mosaic.version = 11 : i64} {
  func.func @_gemm_bias_kernel(%arg0: i32, %arg1: memref<8x288xbf16, #tpu.memory_space<vmem>>, %arg2: memref<288x128xbf16, #tpu.memory_space<vmem>>, %arg3: memref<8x1xf32, #tpu.memory_space<vmem>>, %arg4: memref<8x128xf32, #tpu.memory_space<vmem>>) attributes {dimension_semantics = [#tpu.dimension_semantics<parallel>], iteration_bounds = array<i64: 2>, scalar_prefetch = 0 : i64, scratch_operands = 0 : i64, tpu.core_type = #tpu.core_type<tc>, window_params = [{pipeline_mode = #tpu.pipeline_mode<synchronous>, transform_indices = @transform_0, window_bounds = array<i64: 8, 288>}, {transform_indices = @transform_1, window_bounds = array<i64: 288, 128>}, {pipeline_mode = #tpu.pipeline_mode<synchronous>, transform_indices = @transform_2, window_bounds = array<i64: 8, 1>}, {transform_indices = @transform_3, window_bounds = array<i64: 8, 128>}]} {
    %c0 = arith.constant 0 : index
    %c0_0 = arith.constant 0 : index
    %0 = vector.load %arg1[%c0, %c0_0] : memref<8x288xbf16, #tpu.memory_space<vmem>>, vector<8x288xbf16>
    %c0_1 = arith.constant 0 : index
    %c0_2 = arith.constant 0 : index
    %1 = vector.load %arg2[%c0_1, %c0_2] : memref<288x128xbf16, #tpu.memory_space<vmem>>, vector<288x128xbf16>
    %cst = arith.constant dense<0.000000e+00> : vector<8x128xf32>
    %2 = tpu.matmul %0, %1, %cst {dimension_numbers = #tpu.dot_dimension_numbers<[1], [0], [0], [1], [0, 0, 1, 1], [], []>} : vector<8x288xbf16>, vector<288x128xbf16>, vector<8x128xf32> -> vector<8x128xf32>
    %c0_3 = arith.constant 0 : index
    %c0_4 = arith.constant 0 : index
    %3 = vector.load %arg3[%c0_3, %c0_4] : memref<8x1xf32, #tpu.memory_space<vmem>>, vector<8x1xf32>
    %4 = vector.broadcast %3 : vector<8x1xf32> to vector<8x128xf32>
    %5 = arith.addf %2, %4 : vector<8x128xf32>
    %c0_5 = arith.constant 0 : index
    %c0_6 = arith.constant 0 : index
    %6 = vector.load %arg4[%c0_5, %c0_6] : memref<8x128xf32, #tpu.memory_space<vmem>>, vector<8x128xf32>
    tpu.vector_store %arg4[%c0_5, %c0_6], %5 {strides = array<i32>} : memref<8x128xf32, #tpu.memory_space<vmem>>, vector<8x128xf32>,
    return
  }
  func.func @transform_0(%arg0: i32) -> (i32, i32) {
    %c0_i32 = arith.constant 0 : i32
    %c0_i32_0 = arith.constant 0 : i32
    %c0_i32_1 = arith.constant 0 : i32
    return %c0_i32, %c0_i32_0 : i32, i32
  }
  func.func @transform_1(%arg0: i32) -> (i32, i32) {
    %c0_i32 = arith.constant 0 : i32
    %c0_i32_0 = arith.constant 0 : i32
    return %c0_i32, %arg0 : i32, i32
  }
  func.func @transform_2(%arg0: i32) -> (i32, i32) {
    %c0_i32 = arith.constant 0 : i32
    %c0_i32_0 = arith.constant 0 : i32
    %c0_i32_1 = arith.constant 0 : i32
    return %c0_i32, %c0_i32_0 : i32, i32
  }
  func.func @transform_3(%arg0: i32) -> (i32, i32) {
    %c0_i32 = arith.constant 0 : i32
    %c0_i32_0 = arith.constant 0 : i32
    return %c0_i32, %arg0 : i32, i32
  }
}

module attributes {stable_mosaic.version = 11 : i64} {
  func.func @_gemm_bias_kernel(%arg0: i32, %arg1: memref<32x96xbf16, #tpu.memory_space<vmem>>, %arg2: memref<96x128xbf16, #tpu.memory_space<vmem>>, %arg3: memref<32x1xf32, #tpu.memory_space<vmem>>, %arg4: memref<32x128xf32, #tpu.memory_space<vmem>>) attributes {dimension_semantics = [#tpu.dimension_semantics<parallel>], iteration_bounds = array<i64: 1>, scalar_prefetch = 0 : i64, scratch_operands = 0 : i64, tpu.core_type = #tpu.core_type<tc>, window_params = [{pipeline_mode = #tpu.pipeline_mode<synchronous>, transform_indices = @transform_0, window_bounds = array<i64: 32, 96>}, {transform_indices = @transform_1, window_bounds = array<i64: 96, 128>}, {pipeline_mode = #tpu.pipeline_mode<synchronous>, transform_indices = @transform_2, window_bounds = array<i64: 32, 1>}, {transform_indices = @transform_3, window_bounds = array<i64: 32, 128>}]} {
    %c0 = arith.constant 0 : index
    %c0_0 = arith.constant 0 : index
    %0 = vector.load %arg1[%c0, %c0_0] : memref<32x96xbf16, #tpu.memory_space<vmem>>, vector<32x96xbf16>
    %c0_1 = arith.constant 0 : index
    %c0_2 = arith.constant 0 : index
    %1 = vector.load %arg2[%c0_1, %c0_2] : memref<96x128xbf16, #tpu.memory_space<vmem>>, vector<96x128xbf16>
    %cst = arith.constant dense<0.000000e+00> : vector<32x128xf32>
    %2 = tpu.matmul %0, %1, %cst {dimension_numbers = #tpu.dot_dimension_numbers<[1], [0], [0], [1], [0, 0, 1, 1], [], []>} : vector<32x96xbf16>, vector<96x128xbf16>, vector<32x128xf32> -> vector<32x128xf32>
    %c0_3 = arith.constant 0 : index
    %c0_4 = arith.constant 0 : index
    %3 = vector.load %arg3[%c0_3, %c0_4] : memref<32x1xf32, #tpu.memory_space<vmem>>, vector<32x1xf32>
    %4 = vector.broadcast %3 : vector<32x1xf32> to vector<32x128xf32>
    %5 = arith.addf %2, %4 : vector<32x128xf32>
    %cst_5 = arith.constant 0.000000e+00 : f32
    %6 = vector.broadcast %cst_5 : f32 to vector<32x128xf32>
    %7 = arith.maximumf %5, %6 : vector<32x128xf32>
    %c0_6 = arith.constant 0 : index
    %c0_7 = arith.constant 0 : index
    %8 = vector.load %arg4[%c0_6, %c0_7] : memref<32x128xf32, #tpu.memory_space<vmem>>, vector<32x128xf32>
    tpu.vector_store %arg4[%c0_6, %c0_7], %7 {strides = array<i32>} : memref<32x128xf32, #tpu.memory_space<vmem>>, vector<32x128xf32>,
    return
  }
  func.func @transform_0(%arg0: i32) -> (i32, i32) {
    %c0_i32 = arith.constant 0 : i32
    %c0_i32_0 = arith.constant 0 : i32
    %c0_i32_1 = arith.constant 0 : i32
    return %c0_i32, %c0_i32_0 : i32, i32
  }
  func.func @transform_1(%arg0: i32) -> (i32, i32) {
    %c0_i32 = arith.constant 0 : i32
    %c0_i32_0 = arith.constant 0 : i32
    return %c0_i32, %arg0 : i32, i32
  }
  func.func @transform_2(%arg0: i32) -> (i32, i32) {
    %c0_i32 = arith.constant 0 : i32
    %c0_i32_0 = arith.constant 0 : i32
    %c0_i32_1 = arith.constant 0 : i32
    return %c0_i32, %c0_i32_0 : i32, i32
  }
  func.func @transform_3(%arg0: i32) -> (i32, i32) {
    %c0_i32 = arith.constant 0 : i32
    %c0_i32_0 = arith.constant 0 : i32
    return %c0_i32, %arg0 : i32, i32
  }
}

module attributes {stable_mosaic.version = 11 : i64} {
  func.func @_gemm_bias_kernel(%arg0: i32, %arg1: memref<8x32xbf16, #tpu.memory_space<vmem>>, %arg2: memref<32x128xbf16, #tpu.memory_space<vmem>>, %arg3: memref<8x1xf32, #tpu.memory_space<vmem>>, %arg4: memref<8x128xf32, #tpu.memory_space<vmem>>) attributes {dimension_semantics = [#tpu.dimension_semantics<parallel>], iteration_bounds = array<i64: 1>, scalar_prefetch = 0 : i64, scratch_operands = 0 : i64, tpu.core_type = #tpu.core_type<tc>, window_params = [{pipeline_mode = #tpu.pipeline_mode<synchronous>, transform_indices = @transform_0, window_bounds = array<i64: 8, 32>}, {transform_indices = @transform_1, window_bounds = array<i64: 32, 128>}, {pipeline_mode = #tpu.pipeline_mode<synchronous>, transform_indices = @transform_2, window_bounds = array<i64: 8, 1>}, {transform_indices = @transform_3, window_bounds = array<i64: 8, 128>}]} {
    %c0 = arith.constant 0 : index
    %c0_0 = arith.constant 0 : index
    %0 = vector.load %arg1[%c0, %c0_0] : memref<8x32xbf16, #tpu.memory_space<vmem>>, vector<8x32xbf16>
    %c0_1 = arith.constant 0 : index
    %c0_2 = arith.constant 0 : index
    %1 = vector.load %arg2[%c0_1, %c0_2] : memref<32x128xbf16, #tpu.memory_space<vmem>>, vector<32x128xbf16>
    %cst = arith.constant dense<0.000000e+00> : vector<8x128xf32>
    %2 = tpu.matmul %0, %1, %cst {dimension_numbers = #tpu.dot_dimension_numbers<[1], [0], [0], [1], [0, 0, 1, 1], [], []>} : vector<8x32xbf16>, vector<32x128xbf16>, vector<8x128xf32> -> vector<8x128xf32>
    %c0_3 = arith.constant 0 : index
    %c0_4 = arith.constant 0 : index
    %3 = vector.load %arg3[%c0_3, %c0_4] : memref<8x1xf32, #tpu.memory_space<vmem>>, vector<8x1xf32>
    %4 = vector.broadcast %3 : vector<8x1xf32> to vector<8x128xf32>
    %5 = arith.addf %2, %4 : vector<8x128xf32>
    %c0_5 = arith.constant 0 : index
    %c0_6 = arith.constant 0 : index
    %6 = vector.load %arg4[%c0_5, %c0_6] : memref<8x128xf32, #tpu.memory_space<vmem>>, vector<8x128xf32>
    tpu.vector_store %arg4[%c0_5, %c0_6], %5 {strides = array<i32>} : memref<8x128xf32, #tpu.memory_space<vmem>>, vector<8x128xf32>,
    return
  }
  func.func @transform_0(%arg0: i32) -> (i32, i32) {
    %c0_i32 = arith.constant 0 : i32
    %c0_i32_0 = arith.constant 0 : i32
    %c0_i32_1 = arith.constant 0 : i32
    return %c0_i32, %c0_i32_0 : i32, i32
  }
  func.func @transform_1(%arg0: i32) -> (i32, i32) {
    %c0_i32 = arith.constant 0 : i32
    %c0_i32_0 = arith.constant 0 : i32
    return %c0_i32, %arg0 : i32, i32
  }
  func.func @transform_2(%arg0: i32) -> (i32, i32) {
    %c0_i32 = arith.constant 0 : i32
    %c0_i32_0 = arith.constant 0 : i32
    %c0_i32_1 = arith.constant 0 : i32
    return %c0_i32, %c0_i32_0 : i32, i32
  }
  func.func @transform_3(%arg0: i32) -> (i32, i32) {
    %c0_i32 = arith.constant 0 : i32
    %c0_i32_0 = arith.constant 0 : i32
    return %c0_i32, %arg0 : i32, i32
  }
}

module attributes {stable_mosaic.version = 11 : i64} {
  func.func @_blend_kernel(%arg0: memref<2x3x256xf32, #tpu.memory_space<vmem>>, %arg1: memref<2x3x256xf32, #tpu.memory_space<vmem>>, %arg2: memref<2x1x256xf32, #tpu.memory_space<vmem>>, %arg3: memref<2x1x256xf32, #tpu.memory_space<vmem>>, %arg4: memref<2x3x256xf32, #tpu.memory_space<vmem>>) attributes {dimension_semantics = [], scalar_prefetch = 0 : i64, scratch_operands = 0 : i64, tpu.core_type = #tpu.core_type<tc>} {
    %c0 = arith.constant 0 : index
    %c0_0 = arith.constant 0 : index
    %c0_1 = arith.constant 0 : index
    %0 = vector.load %arg2[%c0, %c0_0, %c0_1] : memref<2x1x256xf32, #tpu.memory_space<vmem>>, vector<2x1x256xf32>
    %1 = arith.negf %0 : vector<2x1x256xf32>
    %2 = math.exp %1 : vector<2x1x256xf32>
    %cst = arith.constant 1.000000e+00 : f32
    %3 = vector.broadcast %cst : f32 to vector<2x1x256xf32>
    %4 = arith.addf %3, %2 : vector<2x1x256xf32>
    %5 = arith.divf %3, %4 : vector<2x1x256xf32>
    %cst_2 = arith.constant 5.000000e-01 : f32
    %6 = vector.broadcast %cst_2 : f32 to vector<2x1x256xf32>
    %7 = arith.mulf %6, %5 : vector<2x1x256xf32>
    %c0_3 = arith.constant 0 : index
    %c0_4 = arith.constant 0 : index
    %c0_5 = arith.constant 0 : index
    %8 = vector.load %arg3[%c0_3, %c0_4, %c0_5] : memref<2x1x256xf32, #tpu.memory_space<vmem>>, vector<2x1x256xf32>
    %9 = arith.negf %8 : vector<2x1x256xf32>
    %10 = math.exp %9 : vector<2x1x256xf32>
    %cst_6 = arith.constant 1.000000e+00 : f32
    %11 = vector.broadcast %cst_6 : f32 to vector<2x1x256xf32>
    %12 = arith.addf %11, %10 : vector<2x1x256xf32>
    %13 = arith.divf %11, %12 : vector<2x1x256xf32>
    %cst_7 = arith.constant 5.000000e-01 : f32
    %14 = vector.broadcast %cst_7 : f32 to vector<2x1x256xf32>
    %15 = arith.mulf %14, %13 : vector<2x1x256xf32>
    %c0_8 = arith.constant 0 : index
    %c0_9 = arith.constant 0 : index
    %c0_10 = arith.constant 0 : index
    %16 = vector.load %arg0[%c0_8, %c0_9, %c0_10] : memref<2x3x256xf32, #tpu.memory_space<vmem>>, vector<2x3x256xf32>
    %17 = vector.broadcast %7 : vector<2x1x256xf32> to vector<2x3x256xf32>
    %18 = arith.mulf %17, %16 : vector<2x3x256xf32>
    %c0_11 = arith.constant 0 : index
    %c0_12 = arith.constant 0 : index
    %c0_13 = arith.constant 0 : index
    %19 = vector.load %arg1[%c0_11, %c0_12, %c0_13] : memref<2x3x256xf32, #tpu.memory_space<vmem>>, vector<2x3x256xf32>
    %20 = vector.broadcast %15 : vector<2x1x256xf32> to vector<2x3x256xf32>
    %21 = arith.mulf %20, %19 : vector<2x3x256xf32>
    %22 = arith.addf %18, %21 : vector<2x3x256xf32>
    %23 = arith.addf %7, %15 : vector<2x1x256xf32>
    %cst_14 = arith.constant 9.99999997E-7 : f32
    %24 = vector.broadcast %cst_14 : f32 to vector<2x1x256xf32>
    %25 = arith.addf %23, %24 : vector<2x1x256xf32>
    %26 = vector.broadcast %25 : vector<2x1x256xf32> to vector<2x3x256xf32>
    %27 = arith.divf %22, %26 : vector<2x3x256xf32>
    %c0_15 = arith.constant 0 : index
    %c0_16 = arith.constant 0 : index
    %c0_17 = arith.constant 0 : index
    %28 = vector.load %arg4[%c0_15, %c0_16, %c0_17] : memref<2x3x256xf32, #tpu.memory_space<vmem>>, vector<2x3x256xf32>
    tpu.vector_store %arg4[%c0_15, %c0_16, %c0_17], %27 {strides = array<i32>} : memref<2x3x256xf32, #tpu.memory_space<vmem>>, vector<2x3x256xf32>,
    return
  }
}

module attributes {stable_mosaic.version = 11 : i64} {
  func.func @_gemm_bias_kernel(%arg0: i32, %arg1: memref<8x96xbf16, #tpu.memory_space<vmem>>, %arg2: memref<96x128xbf16, #tpu.memory_space<vmem>>, %arg3: memref<8x1xf32, #tpu.memory_space<vmem>>, %arg4: memref<8x128xf32, #tpu.memory_space<vmem>>) attributes {dimension_semantics = [#tpu.dimension_semantics<parallel>], iteration_bounds = array<i64: 4>, scalar_prefetch = 0 : i64, scratch_operands = 0 : i64, tpu.core_type = #tpu.core_type<tc>, window_params = [{pipeline_mode = #tpu.pipeline_mode<synchronous>, transform_indices = @transform_0, window_bounds = array<i64: 8, 96>}, {transform_indices = @transform_1, window_bounds = array<i64: 96, 128>}, {pipeline_mode = #tpu.pipeline_mode<synchronous>, transform_indices = @transform_2, window_bounds = array<i64: 8, 1>}, {transform_indices = @transform_3, window_bounds = array<i64: 8, 128>}]} {
    %c0 = arith.constant 0 : index
    %c0_0 = arith.constant 0 : index
    %0 = vector.load %arg1[%c0, %c0_0] : memref<8x96xbf16, #tpu.memory_space<vmem>>, vector<8x96xbf16>
    %c0_1 = arith.constant 0 : index
    %c0_2 = arith.constant 0 : index
    %1 = vector.load %arg2[%c0_1, %c0_2] : memref<96x128xbf16, #tpu.memory_space<vmem>>, vector<96x128xbf16>
    %cst = arith.constant dense<0.000000e+00> : vector<8x128xf32>
    %2 = tpu.matmul %0, %1, %cst {dimension_numbers = #tpu.dot_dimension_numbers<[1], [0], [0], [1], [0, 0, 1, 1], [], []>} : vector<8x96xbf16>, vector<96x128xbf16>, vector<8x128xf32> -> vector<8x128xf32>
    %c0_3 = arith.constant 0 : index
    %c0_4 = arith.constant 0 : index
    %3 = vector.load %arg3[%c0_3, %c0_4] : memref<8x1xf32, #tpu.memory_space<vmem>>, vector<8x1xf32>
    %4 = vector.broadcast %3 : vector<8x1xf32> to vector<8x128xf32>
    %5 = arith.addf %2, %4 : vector<8x128xf32>
    %c0_5 = arith.constant 0 : index
    %c0_6 = arith.constant 0 : index
    %6 = vector.load %arg4[%c0_5, %c0_6] : memref<8x128xf32, #tpu.memory_space<vmem>>, vector<8x128xf32>
    tpu.vector_store %arg4[%c0_5, %c0_6], %5 {strides = array<i32>} : memref<8x128xf32, #tpu.memory_space<vmem>>, vector<8x128xf32>,
    return
  }
  func.func @transform_0(%arg0: i32) -> (i32, i32) {
    %c0_i32 = arith.constant 0 : i32
    %c0_i32_0 = arith.constant 0 : i32
    %c0_i32_1 = arith.constant 0 : i32
    return %c0_i32, %c0_i32_0 : i32, i32
  }
  func.func @transform_1(%arg0: i32) -> (i32, i32) {
    %c0_i32 = arith.constant 0 : i32
    %c0_i32_0 = arith.constant 0 : i32
    return %c0_i32, %arg0 : i32, i32
  }
  func.func @transform_2(%arg0: i32) -> (i32, i32) {
    %c0_i32 = arith.constant 0 : i32
    %c0_i32_0 = arith.constant 0 : i32
    %c0_i32_1 = arith.constant 0 : i32
    return %c0_i32, %c0_i32_0 : i32, i32
  }
  func.func @transform_3(%arg0: i32) -> (i32, i32) {
    %c0_i32 = arith.constant 0 : i32
    %c0_i32_0 = arith.constant 0 : i32
    return %c0_i32, %arg0 : i32, i32
  }
}

</mosaic_0001>

<bundles_post_ra>
// kernel: model_forward.8
= control target key start
LH: loop header
LB: loop body
LE: loop exit
PB: predicated region body
PF: predicated region fallthrough
CT: control target
= control target key end

     0   :  { %vm33_vm0 = vcmask 523264   ;;  %vm35_vm1 = vcmask 519168   ;;  %s96_s0 = inlined_call_operand.vmem [shape: f32[12,64], index: 0, kind: input, shape index: {}]   ;;  %s97_s1 = inlined_call_operand.vmem [shape: f32[12,64], index: 1, kind: input, shape index: {}]   ;;  %s98_s2 = inlined_call_operand.vmem [shape: f32[12,64], index: 2, kind: input, shape index: {}]   ;;  %s99_s3 = inlined_call_operand.vmem [shape: f32[12,64], index: 3, kind: input, shape index: {}]   ;;  %s100_s4 = inlined_call_operand.vmem [shape: f32[12,64], index: 4, kind: output, shape index: {}]  }
   0x1   :  { %v17_v0 = vld [vmem:[%s96_s0] sm:$0xff]  ;;  %v18_v4 = vld [vmem:[%s96_s0 + $0x8] sm:$0xf] }
   0x2   :  { %v19_v1 = vld [vmem:[%s97_s1] sm:$0xff]  ;;  %v20_v5 = vld [vmem:[%s97_s1 + $0x8] sm:$0xf] }
   0x3   :  { %v23_v2 = vld [vmem:[%s98_s2] sm:$0xff]  ;;  %v21_v3 = vadd.f32 %v19_v1, %v17_v0  ;;  %v22_v7 = vadd.f32 %v20_v5, %v18_v4  ;;  %v24_v8 = vld [vmem:[%s98_s2 + $0x8] sm:$0xf] }
   0x4   :  { %v27_v6 = vld [vmem:[%s99_s3] sm:$0xff]  ;;  %v28_v10 = vld [vmem:[%s99_s3 + $0x8] sm:$0xf] }
   0x5   :  { %v25_v9 = vadd.f32 %v23_v2, %v21_v3  ;;  %v26_v11 = vadd.f32 %v24_v8, %v22_v7 }
   0x7   :  { %v29_v12 = vadd.f32 %v27_v6, %v25_v9  ;;  %v30_v13 = vadd.f32 %v28_v10, %v26_v11 }
   0x9   :  { %v31_v14 = vmul.f32 0.25, %v29_v12  ;;  %v32_v15 = vmul.f32 0.25, %v30_v13 }
   0xb   :  { %34 = vst.msk [vmem:[%s100_s4] sm:$0xff] %vm33_vm0, %v31_v14 }
   0xc   :  { %36 = vst.msk [vmem:[%s100_s4 + $0x8] sm:$0xf] %vm35_vm1, %v32_v15 }

// kernel: model_forward.9
= control target key start
LH: loop header
LB: loop body
LE: loop exit
PB: predicated region body
PF: predicated region fallthrough
CT: control target
= control target key end

     0   :  { %s595_s12 = smov 0   ;;  %s597_s13 = smov 0   ;;  %s679_s0 = inlined_call_operand.vmem [shape: bf16[32,64], index: 0, kind: input, shape index: {}]   ;;  %s680_s1 = inlined_call_operand.vmem [shape: bf16[64,256], index: 1, kind: input, shape index: {}]   ;;  %s681_s2 = inlined_call_operand.vmem [shape: f32[32,1], index: 2, kind: input, shape index: {}]   ;;  %s682_s3 = inlined_call_operand.vmem [shape: f32[32,256], index: 3, kind: output, shape index: {}]  }
   0x1   :  { %s599_s14 = smov 0  }
   0x2 LB: > { %s478_s15 = sadd.s32 4294967295, %s572_s14   ;;  %s612_s16 = sadd.s32 1, %s572_s14   ;;  %s572_s14 = sphi %s599_s14, %s686_s14   ;;  %s568_s13 = sphi %s597_s13, %s685_s13   ;;  %s564_s12 = sphi %s595_s12, %s684_s12  }
   0x3   : > { %s38_s17 = ssub.s32 %s572_s14, %s612_s16  ;;  %s41_s18 = sadd.s32 1, %s568_s13 }
   0x4   : > { %p39_p0 = scmp.eq.s32.totalorder %s38_s17, 0  ;;  %p48_p1 = scmp.ne.s32.totalorder %s568_s13, %s564_s12 }
   0x5   : > { %p49_p2 = scmp.eq.s32.totalorder %s572_s14, 0  ;;  %p99_p3 = scmp.eq.s32.totalorder %s478_s15, 1 }
   0x6   : > { %s623_s19 = scalar_select %p39_p0, %s568_s13, %s41_s18  }
   0x7   : > { %p50_p4 = por %p49_p2, %p48_p1  ;;  %p625_p5 = por %p99_p3, %p48_p1 }
   0x8   : > { %p481_p6 = scmp.ge.s32.totalorder %s572_s14, 2 }
   0xa   : > { %127 = sbr.rel (%p481_p6) target bundleno = 26 (0x1a), region = 24 }
  0x11   : > { %130 = sbr.rel (!%p50_p4) target bundleno = 26 (0x1a), region = 28  ;;  %s132_s21 = sand.u32 (%p50_p4), 1, %s568_s13  }
  0x12   : > { %s483_s22 = sshll.u32 (%p50_p4), %s572_s14, 2  ;;  %s482_s23 = sshll.u32 (%p50_p4), %s132_s21, 5 }
  0x13   : > { %s136_s26 = scalar_lea.vmem (%p50_p4), %s680_s1, %s483_s22  ;;  %s134_s27 = scalar_lea.vmem (%p50_p4), [#allocation2], %s482_s23 }
  0x14   : > { %v152_v0 = vld [vmem:[%s136_s26] sm:$0xf] (%p50_p4)  ;;  %v154_v1 = vld [vmem:[%s136_s26 + $0x8] sm:$0xf] (%p50_p4)  ;;  %v156_v2 = vld [vmem:[%s136_s26 + $0x10] sm:$0xf] (%p50_p4) }
  0x15   : > { %153 = vst [vmem:[%s134_s27] sm:$0xf] (%p50_p4), %v152_v0  ;;  %155 = vst [vmem:[%s134_s27 + $0x4] sm:$0xf] (%p50_p4), %v154_v1  ;;  %v158_v3 = vld [vmem:[%s136_s26 + $0x18] sm:$0xf] (%p50_p4) }
  0x16   : > { %v160_v4 = vld [vmem:[%s136_s26 + $0x20] sm:$0xf] (%p50_p4)  ;;  %157 = vst [vmem:[%s134_s27 + $0x8] sm:$0xf] (%p50_p4), %v156_v2  ;;  %159 = vst [vmem:[%s134_s27 + $0xc] sm:$0xf] (%p50_p4), %v158_v3 }
  0x17   : > { %161 = vst [vmem:[%s134_s27 + $0x10] sm:$0xf] (%p50_p4), %v160_v4  ;;  %v162_v5 = vld [vmem:[%s136_s26 + $0x28] sm:$0xf] (%p50_p4)  ;;  %v164_v6 = vld [vmem:[%s136_s26 + $0x30] sm:$0xf] (%p50_p4) }
  0x18   : > { %v166_v7 = vld [vmem:[%s136_s26 + $0x38] sm:$0xf]  ;;  %163 = vst [vmem:[%s134_s27 + $0x14] sm:$0xf] %v162_v5  ;;  %165 = vst [vmem:[%s134_s27 + $0x18] sm:$0xf] %v164_v6 }
  0x19   : > { %167 = vst [vmem:[%s134_s27 + $0x1c] sm:$0xf] %v166_v7 }
  0x1a PF: > { %p484_p7 = scmp.ge.s32.totalorder %s572_s14, 1  ;;  %p205_p8 = scmp.lt.s32.totalorder %s572_s14, 3 }
  0x1c   : > { %p206_p9 = pnand %p484_p7, %p205_p8 }
  0x1d   : > { %s212_s28 = sand.u32 (!%p206_p9), 1, %s564_s12   ;;  %v548_v8 = vld [vmem:[%s679_s0] sm:$0xff] (!%p206_p9)   ;;  %vm305_vm0 = vcmask (!%p206_p9), 523264   ;;  %v249_v9 = vld [vmem:[%s681_s2 + $0x10] sm:$0xff] (!%p206_p9)  ;;  %v574_v12 = vmov (!%p206_p9), 0   ;;  %v250_v15 = vld [vmem:[%s681_s2 + $0x18] sm:$0xff] (!%p206_p9) }
  0x1e   : > { %209 = sbr.rel (%p206_p9) target bundleno = 277 (0x115), region = 69  ;;  %s641_s4 = sshll.u32 (!%p206_p9), %s212_s28, 5  ;;  %513 = vmatprep.mubr.msk.bf16.mxu0 (!%p206_p9), %vm305_vm0, %v548_v8  ;;  %v247_v10 = vld [vmem:[%s681_s2] sm:$0xff] (!%p206_p9)  ;;  %543 = vset.pattern.permute.xlu1 (!%p206_p9), %v574_v12  ;;  %v248_v16 = vld [vmem:[%s681_s2 + $0x8] sm:$0xff] (!%p206_p9) }
  0x1f   : > { %s214_s9 = scalar_lea.vmem (!%p206_p9), [#allocation2], %s641_s4  ;;  %542 = vset.pattern.permute.xlu0 (!%p206_p9), %v574_v12  ;;  %263 = vperm.xlu1 (!%p206_p9), %543, %v249_v9   ;;  %v549_v18 = vld [vmem:[%s679_s0 + $0x8] sm:$0xff] (!%p206_p9)   ;;  %s233_s22 = scalar_lea.vmem (!%p206_p9), [#allocation3], %s641_s4 }
  0x20   : > { %v544_v11 = vld [vmem:[%s214_s9] sm:$0xff] (!%p206_p9)   ;;  %v545_v13 = vld [vmem:[%s214_s9 + $0x8] sm:$0xff] (!%p206_p9)   ;;  %253 = vperm.xlu0 (!%p206_p9), %542, %v247_v10   ;;  %v546_v14 = vld [vmem:[%s214_s9 + $0x10] sm:$0xff] (!%p206_p9)  }
  0x21   : > { %505 = vmatprep.subr.bf16.mxu0 (!%p206_p9), %v544_v11  ;;  %v547_v17 = vld [vmem:[%s214_s9 + $0x18] sm:$0xff] (!%p206_p9)  }
  0x22   : > { %506 = vmatpush3.bf16.msra.mxu0 (!%p206_p9), %v544_v11 }
  0x23   : > { %507 = vmatprep.subr.bf16.mxu0 (!%p206_p9), %v545_v13  ;;  %268 = vperm.xlu1 (!%p206_p9), %543, %v250_v15  }
  0x24   : > { %258 = vperm.xlu0 (!%p206_p9), %542, %v248_v16  }
  0x25   : > { %s496_s23 = sshll.u32 (%p625_p5), %s478_s15, 3 }
  0x26   : > { %508 = vmatpush3.bf16.msra.mxu0 %v545_v13  ;;  %s377_s26 = scalar_lea.vmem (%p625_p5), %s682_s3, %s496_s23 }
  0x27   : > { %509 = vmatprep.subr.bf16.mxu0 %v546_v14 }
  0x2a   : > { %510 = vmatpush3.bf16.msra.mxu0 %v546_v14 }
  0x2b   : > { %511 = vmatprep.subr.bf16.mxu0 %v547_v17 }
  0x2e   : > { %512 = vmatpush3.bf16.msra.mxu0 %v547_v17 }
  0x31   : > { %514 = vmatmul.mubr.msk.bf16.vlgmr.msra.gmra.mrb[0].mxu0 %vm305_vm0, %v549_v18 }
  0x9e   : > { %v264_v19 = vpop.permute.xlu1 %263 }
  0x9f   : > { %v254_v20 = vpop.permute.xlu0 %253 }
  0xa2   : > { %v269_v24 = vpop.permute.xlu1 %268 }
  0xa3   : > { %v259_v27 = vpop.permute.xlu0 %258 }
 0x104   : > { %v515_v21 = vpop.f32.mrb[0].mxu0 }
 0x105   : > { %v355_v22 = vadd.f32 %v515_v21, %v264_v19  ;;  %v346_v23 = vpop.f32.mrb[1].mxu0 }
 0x106   : > { %v347_v25 = vadd.f32 %v346_v23, %v254_v20  ;;  %v516_v26 = vpop.f32.mrb[2].mxu0  ;;  %375 = sbr.rel (!%p625_p5) target bundleno = 277 (0x115), region = 77 }
 0x107   : > { %v363_v28 = vmax.f32 %v355_v22, 0.0  ;;  %v358_v29 = vadd.f32 %v516_v26, %v269_v24  ;;  %v349_v30 = vpop.f32.mrb[3].mxu0 }
 0x108   : > { %v361_v31 = vmax.f32 %v347_v25, 0.0  ;;  %v350_v32 = vadd.f32 %v349_v30, %v259_v27 }
 0x109   : > { %367 = vst [vmem:[%s233_s22 + $0x10] sm:$0xff] %v363_v28  ;;  %v364_v33 = vmax.f32 %v358_v29, 0.0 }
 0x10a   : > { %365 = vst [vmem:[%s233_s22] sm:$0xff] %v361_v31  ;;  %v362_v34 = vmax.f32 %v350_v32, 0.0 }
 0x10b   : > { %368 = vst [vmem:[%s233_s22 + $0x18] sm:$0xff] %v364_v33 }
 0x10c   : > { %366 = vst [vmem:[%s233_s22 + $0x8] sm:$0xff] %v362_v34 }
 0x110   : > { %v415_v37 = vld [vmem:[%s233_s22 + $0x10] sm:$0xff] }
 0x111   : > { %v411_v35 = vld [vmem:[%s233_s22] sm:$0xff]  ;;  %416 = vst [vmem:[%s377_s26 + $0x20] sm:$0xff] %v415_v37 }
 0x112   : > { %v417_v38 = vld [vmem:[%s233_s22 + $0x18] sm:$0xff]  ;;  %412 = vst [vmem:[%s377_s26] sm:$0xff] %v411_v35 }
 0x113   : > { %v413_v36 = vld [vmem:[%s233_s22 + $0x8] sm:$0xff]  ;;  %418 = vst [vmem:[%s377_s26 + $0x30] sm:$0xff] %v417_v38 }
 0x114   : > { %414 = vst [vmem:[%s377_s26 + $0x10] sm:$0xff] %v413_v36 }
 0x115 PF: > { %p10_p10 = scmp.ge.s32.totalorder %s612_s16, 4   ;;  %s684_s12 = smov %s568_s13 }
 0x116   : > { %s685_s13 = smov %s623_s19  ;;  %s686_s14 = smov %s612_s16 }
 0x117   :  { %12 = sbr.rel (!%p10_p10) target bundleno = 2 (0x2), region = 146 }

// kernel: model_forward.10
= control target key start
LH: loop header
LB: loop body
LE: loop exit
PB: predicated region body
PF: predicated region fallthrough
CT: control target
= control target key end

     0   :  { %s952_s12 = smov 0   ;;  %s954_s13 = smov 0   ;;  %s1144_s0 = inlined_call_operand.vmem [shape: bf16[32,288], index: 0, kind: input, shape index: {}]   ;;  %s1145_s1 = inlined_call_operand.vmem [shape: bf16[288,256], index: 1, kind: input, shape index: {}]   ;;  %s1146_s2 = inlined_call_operand.vmem [shape: f32[32,1], index: 2, kind: input, shape index: {}]   ;;  %s1147_s3 = inlined_call_operand.vmem [shape: f32[32,256], index: 3, kind: output, shape index: {}]  }
   0x1   :  { %s956_s14 = smov 0  }
   0x2 LB: > { %s775_s15 = sadd.s32 4294967295, %s929_s14   ;;  %s969_s16 = sadd.s32 1, %s929_s14   ;;  %s929_s14 = sphi %s956_s14, %s1151_s14   ;;  %s925_s13 = sphi %s954_s13, %s1150_s13   ;;  %s921_s12 = sphi %s952_s12, %s1149_s12  }
   0x3   : > { %s38_s17 = ssub.s32 %s929_s14, %s969_s16  ;;  %s41_s18 = sadd.s32 1, %s925_s13 }
   0x4   : > { %p39_p0 = scmp.eq.s32.totalorder %s38_s17, 0  ;;  %p48_p1 = scmp.ne.s32.totalorder %s925_s13, %s921_s12 }
   0x5   : > { %p49_p2 = scmp.eq.s32.totalorder %s929_s14, 0  ;;  %p99_p3 = scmp.eq.s32.totalorder %s775_s15, 1 }
   0x6   : > { %s980_s19 = scalar_select %p39_p0, %s925_s13, %s41_s18  }
   0x7   : > { %p50_p4 = por %p49_p2, %p48_p1  ;;  %p982_p5 = por %p99_p3, %p48_p1 }
   0x8   : > { %p778_p6 = scmp.ge.s32.totalorder %s929_s14, 2 }
   0xa   : > { %127 = sbr.rel (%p778_p6) target bundleno = 45 (0x2d), region = 24 }
  0x11   : > { %130 = sbr.rel (!%p50_p4) target bundleno = 45 (0x2d), region = 28  ;;  %s132_s21 = sand.u32 (%p50_p4), 1, %s925_s13  }
  0x12   : > { %s779_s22 = sshll.u32 (%p50_p4), %s929_s14, 2  ;;  %s852_s23 = smul.u32 (%p50_p4), 144, %s132_s21 }
  0x13   : > { %s992_s26 = scalar_lea.vmem (%p50_p4), %s1145_s1, %s779_s22 }
  0x14   : > { %v152_v0 = vld [vmem:[%s992_s26] sm:$0xf] (%p50_p4)  ;;  %v154_v1 = vld [vmem:[%s992_s26 + $0x8] sm:$0xf] (%p50_p4)  ;;  %v156_v2 = vld [vmem:[%s992_s26 + $0x10] sm:$0xf] (%p50_p4) }
  0x15   : > { %v158_v3 = vld [vmem:[%s992_s26 + $0x18] sm:$0xf] (%p50_p4)  ;;  %v160_v4 = vld [vmem:[%s992_s26 + $0x20] sm:$0xf] (%p50_p4)  ;;  %s999_s27 = scalar_lea.vmem (%p50_p4), [#allocation2], %s852_s23 }
  0x16   : > { %153 = vst [vmem:[%s999_s27] sm:$0xf] (%p50_p4), %v152_v0  ;;  %155 = vst [vmem:[%s999_s27 + $0x4] sm:$0xf] (%p50_p4), %v154_v1  ;;  %v162_v5 = vld [vmem:[%s992_s26 + $0x28] sm:$0xf] (%p50_p4) }
  0x17   : > { %157 = vst [vmem:[%s999_s27 + $0x8] sm:$0xf] (%p50_p4), %v156_v2  ;;  %159 = vst [vmem:[%s999_s27 + $0xc] sm:$0xf] (%p50_p4), %v158_v3  ;;  %v164_v6 = vld [vmem:[%s992_s26 + $0x30] sm:$0xf] (%p50_p4) }
  0x18   : > { %161 = vst [vmem:[%s999_s27 + $0x10] sm:$0xf] %v160_v4  ;;  %v166_v7 = vld [vmem:[%s992_s26 + $0x38] sm:$0xf]  ;;  %163 = vst [vmem:[%s999_s27 + $0x14] sm:$0xf] %v162_v5 }
  0x19   : > { %165 = vst [vmem:[%s999_s27 + $0x18] sm:$0xf] %v164_v6  ;;  %167 = vst [vmem:[%s999_s27 + $0x1c] sm:$0xf] %v166_v7  ;;  %v168_v8 = vld [vmem:[%s992_s26 + $0x40] sm:$0xf] }
  0x1a   : > { %v170_v9 = vld [vmem:[%s992_s26 + $0x48] sm:$0xf]  ;;  %v172_v10 = vld [vmem:[%s992_s26 + $0x50] sm:$0xf]  ;;  %169 = vst [vmem:[%s999_s27 + $0x20] sm:$0xf] %v168_v8 }
  0x1b   : > { %171 = vst [vmem:[%s999_s27 + $0x24] sm:$0xf] %v170_v9  ;;  %173 = vst [vmem:[%s999_s27 + $0x28] sm:$0xf] %v172_v10  ;;  %v174_v11 = vld [vmem:[%s992_s26 + $0x58] sm:$0xf] }
  0x1c   : > { %v176_v12 = vld [vmem:[%s992_s26 + $0x60] sm:$0xf]  ;;  %v178_v13 = vld [vmem:[%s992_s26 + $0x68] sm:$0xf]  ;;  %175 = vst [vmem:[%s999_s27 + $0x2c] sm:$0xf] %v174_v11 }
  0x1d   : > { %177 = vst [vmem:[%s999_s27 + $0x30] sm:$0xf] %v176_v12  ;;  %179 = vst [vmem:[%s999_s27 + $0x34] sm:$0xf] %v178_v13  ;;  %v180_v14 = vld [vmem:[%s992_s26 + $0x70] sm:$0xf] }
  0x1e   : > { %v182_v15 = vld [vmem:[%s992_s26 + $0x78] sm:$0xf]  ;;  %v184_v16 = vld [vmem:[%s992_s26 + $0x80] sm:$0xf]  ;;  %181 = vst [vmem:[%s999_s27 + $0x38] sm:$0xf] %v180_v14 }
  0x1f   : > { %183 = vst [vmem:[%s999_s27 + $0x3c] sm:$0xf] %v182_v15  ;;  %185 = vst [vmem:[%s999_s27 + $0x40] sm:$0xf] %v184_v16  ;;  %v186_v17 = vld [vmem:[%s992_s26 + $0x88] sm:$0xf] }
  0x20   : > { %v188_v18 = vld [vmem:[%s992_s26 + $0x90] sm:$0xf]  ;;  %v190_v19 = vld [vmem:[%s992_s26 + $0x98] sm:$0xf]  ;;  %187 = vst [vmem:[%s999_s27 + $0x44] sm:$0xf] %v186_v17 }
  0x21   : > { %189 = vst [vmem:[%s999_s27 + $0x48] sm:$0xf] %v188_v18  ;;  %191 = vst [vmem:[%s999_s27 + $0x4c] sm:$0xf] %v190_v19  ;;  %v192_v20 = vld [vmem:[%s992_s26 + $0xa0] sm:$0xf] }
  0x22   : > { %v194_v21 = vld [vmem:[%s992_s26 + $0xa8] sm:$0xf]  ;;  %v196_v22 = vld [vmem:[%s992_s26 + $0xb0] sm:$0xf]  ;;  %193 = vst [vmem:[%s999_s27 + $0x50] sm:$0xf] %v192_v20 }
  0x23   : > { %195 = vst [vmem:[%s999_s27 + $0x54] sm:$0xf] %v194_v21  ;;  %197 = vst [vmem:[%s999_s27 + $0x58] sm:$0xf] %v196_v22  ;;  %v198_v23 = vld [vmem:[%s992_s26 + $0xb8] sm:$0xf] }
  0x24   : > { %v200_v24 = vld [vmem:[%s992_s26 + $0xc0] sm:$0xf]  ;;  %v202_v25 = vld [vmem:[%s992_s26 + $0xc8] sm:$0xf]  ;;  %199 = vst [vmem:[%s999_s27 + $0x5c] sm:$0xf] %v198_v23 }
  0x25   : > { %201 = vst [vmem:[%s999_s27 + $0x60] sm:$0xf] %v200_v24  ;;  %203 = vst [vmem:[%s999_s27 + $0x64] sm:$0xf] %v202_v25  ;;  %v204_v26 = vld [vmem:[%s992_s26 + $0xd0] sm:$0xf] }
  0x26   : > { %v206_v27 = vld [vmem:[%s992_s26 + $0xd8] sm:$0xf]  ;;  %v208_v28 = vld [vmem:[%s992_s26 + $0xe0] sm:$0xf]  ;;  %205 = vst [vmem:[%s999_s27 + $0x68] sm:$0xf] %v204_v26 }
  0x27   : > { %207 = vst [vmem:[%s999_s27 + $0x6c] sm:$0xf] %v206_v27  ;;  %209 = vst [vmem:[%s999_s27 + $0x70] sm:$0xf] %v208_v28  ;;  %v210_v29 = vld [vmem:[%s992_s26 + $0xe8] sm:$0xf] }
  0x28   : > { %v212_v30 = vld [vmem:[%s992_s26 + $0xf0] sm:$0xf]  ;;  %v214_v31 = vld [vmem:[%s992_s26 + $0xf8] sm:$0xf]  ;;  %211 = vst [vmem:[%s999_s27 + $0x74] sm:$0xf] %v210_v29 }
  0x29   : > { %213 = vst [vmem:[%s999_s27 + $0x78] sm:$0xf] %v212_v30  ;;  %215 = vst [vmem:[%s999_s27 + $0x7c] sm:$0xf] %v214_v31  ;;  %v216_v32 = vld [vmem:[%s992_s26 + $0x100] sm:$0xf] }
  0x2a   : > { %v218_v33 = vld [vmem:[%s992_s26 + $0x108] sm:$0xf]  ;;  %v220_v34 = vld [vmem:[%s992_s26 + $0x110] sm:$0xf]  ;;  %217 = vst [vmem:[%s999_s27 + $0x80] sm:$0xf] %v216_v32 }
  0x2b   : > { %219 = vst [vmem:[%s999_s27 + $0x84] sm:$0xf] %v218_v33  ;;  %221 = vst [vmem:[%s999_s27 + $0x88] sm:$0xf] %v220_v34  ;;  %v222_v35 = vld [vmem:[%s992_s26 + $0x118] sm:$0xf] }
  0x2c   : > { %223 = vst [vmem:[%s999_s27 + $0x8c] sm:$0xf] %v222_v35 }
  0x2d PF: > { %p780_p7 = scmp.ge.s32.totalorder %s929_s14, 1  ;;  %p317_p8 = scmp.lt.s32.totalorder %s929_s14, 3 }
  0x2f   : > { %p318_p9 = pnand %p780_p7, %p317_p8 }
  0x30   : > { %s324_s28 = sand.u32 (!%p318_p9), 1, %s921_s12   ;;  %vm553_vm0 = vcmask (!%p318_p9), 261120   ;;  %v900_v36 = vld [vmem:[%s1144_s0 + $0x4] ss:$12 sps:$4 sm:$0xff] (!%p318_p9)   ;;  %v902_v37 = vld [vmem:[%s1144_s0 + $0x8] ss:$12 sps:$4 sm:$0xff] (!%p318_p9)  }
  0x31   : > { %321 = sbr.rel (%p318_p9) target bundleno = 326 (0x146), region = 69  ;;  %592 = vmatprep.mubr.bf16.mxu0 (!%p318_p9), %v900_v36  ;;  %848 = vmatprep.mubr.msk.bf16.mxu1 (!%p318_p9), %vm553_vm0, %v902_v37  ;;  %v931_v40 = vmov (!%p318_p9), 0   ;;  %v391_v52 = vld [vmem:[%s1146_s2] sm:$0xff] (!%p318_p9)  ;;  %v393_v54 = vld [vmem:[%s1146_s2 + $0x10] sm:$0xff] (!%p318_p9)  ;;  %v392_v57 = vld [vmem:[%s1146_s2 + $0x8] sm:$0xff] (!%p318_p9)  ;;  %s781_s5 = sshll.u32 (!%p318_p9), %s324_s28, 5 }
  0x32   : > { %s853_s29 = smul.u32 (!%p318_p9), 144, %s324_s28  ;;  %879 = vset.pattern.permute.xlu0 (!%p318_p9), %v931_v40  ;;  %880 = vset.pattern.permute.xlu1 (!%p318_p9), %v931_v40  ;;  %v903_v56 = vld [vmem:[%s1144_s0 + $0x20] ss:$12 sps:$4 sm:$0xff] (!%p318_p9)   ;;  %v394_v58 = vld [vmem:[%s1146_s2 + $0x18] sm:$0xff] (!%p318_p9)  ;;  %s345_s6 = scalar_lea.vmem (!%p318_p9), [#allocation3], %s781_s5 }
  0x33   : > { %397 = vperm.xlu0 (!%p318_p9), %879, %v391_v52   ;;  %407 = vperm.xlu1 (!%p318_p9), %880, %v393_v54   ;;  %v898_v62 = vld [vmem:[%s1144_s0] ss:$12 sps:$4 sm:$0xff] (!%p318_p9)   ;;  %v904_v63 = vld [vmem:[%s1144_s0 + $0x1c] ss:$12 sps:$4 sm:$0xff] (!%p318_p9)   ;;  %v906_v0 = vld [vmem:[%s1144_s0 + $0x18] ss:$12 sps:$4 sm:$0xff] (!%p318_p9)  }
  0x34   : > { %s1079_s7 = scalar_lea.vmem (!%p318_p9), [#allocation2], %s853_s29 }
  0x35   : > { %v881_v38 = vld [vmem:[%s1079_s7 + $0x40] sm:$0xff] (!%p318_p9)   ;;  %v883_v41 = vld [vmem:[%s1079_s7 + $0x48] sm:$0xff] (!%p318_p9)   ;;  %v885_v43 = vld [vmem:[%s1079_s7 + $0x50] sm:$0xff] (!%p318_p9)  }
  0x36   : > { %v882_v39 = vld [vmem:[%s1079_s7] sm:$0xff] (!%p318_p9)   ;;  %812 = vmatprep.subr.bf16.mxu0 (!%p318_p9), %v881_v38  ;;  %v884_v42 = vld [vmem:[%s1079_s7 + $0x8] sm:$0xff] (!%p318_p9)   ;;  %v886_v44 = vld [vmem:[%s1079_s7 + $0x10] sm:$0xff] (!%p318_p9)  }
  0x37   : > { %813 = vmatpush3.bf16.msra.mxu0 (!%p318_p9), %v882_v39  ;;  %v887_v45 = vld [vmem:[%s1079_s7 + $0x58] sm:$0xff] (!%p318_p9)   ;;  %v889_v47 = vld [vmem:[%s1079_s7 + $0x60] sm:$0xff] (!%p318_p9)   ;;  %v891_v50 = vld [vmem:[%s1079_s7 + $0x68] sm:$0xff] (!%p318_p9)   ;;  %402 = vperm.xlu0 (!%p318_p9), %879, %v392_v57  }
  0x38   : > { %814 = vmatprep.subr.bf16.mxu0 %v883_v41  ;;  %v888_v46 = vld [vmem:[%s1079_s7 + $0x18] sm:$0xff]   ;;  %v890_v48 = vld [vmem:[%s1079_s7 + $0x20] sm:$0xff]   ;;  %v901_v51 = vld [vmem:[%s1079_s7 + $0x88] sm:$0xff]   ;;  %412 = vperm.xlu1 %880, %v394_v58   ;;  %s809_s12 = sshll.u32 (%p982_p5), %s775_s15, 3 }
  0x39   : > { %v896_v49 = vld [vmem:[%s1079_s7 + $0x80] sm:$0xff]   ;;  %v892_v53 = vld [vmem:[%s1079_s7 + $0x28] sm:$0xff]   ;;  %v893_v55 = vld [vmem:[%s1079_s7 + $0x70] sm:$0xff]   ;;  %s674_s8 = scalar_lea.vmem (%p982_p5), %s1147_s3, %s809_s12 }
  0x3a   : > { %844 = vmatprep.subr.bf16.mxu1 %v896_v49  ;;  %v894_v59 = vld [vmem:[%s1079_s7 + $0x30] sm:$0xff]   ;;  %v895_v60 = vld [vmem:[%s1079_s7 + $0x78] sm:$0xff]  }
  0x3b   : > { %815 = vmatpush3.bf16.msra.mxu0 %v884_v42  ;;  %845 = vmatpush3.bf16.msra.mxu1 %v896_v49  ;;  %v897_v61 = vld [vmem:[%s1079_s7 + $0x38] sm:$0xff]  }
  0x3c   : > { %816 = vmatprep.subr.bf16.mxu0 %v885_v43  ;;  %846 = vmatprep.subr.bf16.mxu1 %v901_v51 }
  0x3f   : > { %817 = vmatpush3.bf16.msra.mxu0 %v886_v44  ;;  %847 = vmatpush3.bf16.msra.mxu1 %v901_v51 }
  0x40   : > { %818 = vmatprep.subr.bf16.mxu0 %v887_v45 }
  0x42   : > { %849 = vmatmul.mubr.msk.bf16.vlgmr.msra.gmra.mrb[0].mxu1 %vm553_vm0, %v903_v56 }
  0x43   : > { %819 = vmatpush3.bf16.msra.mxu0 %v888_v46 }
  0x44   : > { %820 = vmatprep.subr.bf16.mxu0 %v889_v47 }
  0x47   : > { %821 = vmatpush3.bf16.msra.mxu0 %v890_v48 }
  0x48   : > { %822 = vmatprep.subr.bf16.mxu0 %v891_v50 }
  0x4b   : > { %823 = vmatpush3.bf16.msra.mxu0 %v892_v53 }
  0x4c   : > { %824 = vmatprep.subr.bf16.mxu0 %v893_v55 }
  0x4f   : > { %825 = vmatpush3.bf16.msra.mxu0 %v894_v59 }
  0x50   : > { %826 = vmatprep.subr.bf16.mxu0 %v895_v60 }
  0x53   : > { %827 = vmatpush3.bf16.msra.mxu0 %v897_v61 }
  0x56   : > { %593 = vmatmul.mubr.bf16.vlgmr.msra.gmra.mrb[0].mxu0 %v898_v62 }
  0x57   : > { %600 = vmatprep.mubr.bf16.mxu0 %v904_v63 }
  0x5e   : > { %601 = vmatmul.mubr.bf16.gmra.mrb[4].mxu0 %v906_v0 }
  0xb2   : > { %v398_v5 = vpop.permute.xlu0 %397  ;;  %v408_v16 = vpop.permute.xlu1 %407 }
  0xb6   : > { %v403_v11 = vpop.permute.xlu0 %402 }
  0xb7   : > { %v413_v27 = vpop.permute.xlu1 %412 }
 0x115   : > { %v850_v1 = vpop.f32.mrb[0].mxu1 }
 0x116   : > { %v643_v2 = vpop.f32.mrb[1].mxu1 }
 0x117   : > { %v851_v3 = vpop.f32.mrb[2].mxu1 }
 0x118   : > { %v646_v4 = vpop.f32.mrb[3].mxu1 }
 0x129   : > { %v828_v6 = vpop.f32.mrb[0].mxu0 }
 0x12a   : > { %v829_v7 = vpop.f32.mrb[1].mxu0 }
 0x12b   : > { %v830_v8 = vadd.f32 %v829_v7, %v828_v6  ;;  %v831_v9 = vpop.f32.mrb[2].mxu0 }
 0x12c   : > { %v832_v10 = vpop.f32.mrb[3].mxu0 }
 0x12d   : > { %v833_v12 = vadd.f32 %v832_v10, %v831_v9  ;;  %v595_v13 = vadd.f32 %v830_v8, %v398_v5 }
 0x12f   : > { %v598_v14 = vadd.f32 %v833_v12, %v403_v11  ;;  %v644_v15 = vadd.f32 %v643_v2, %v595_v13 }
 0x131   : > { %v658_v17 = vmax.f32 %v644_v15, 0.0  ;;  %v647_v18 = vadd.f32 %v646_v4, %v598_v14  ;;  %v834_v19 = vpop.f32.mrb[4].mxu0 }
 0x132   : > { %v835_v20 = vpop.f32.mrb[5].mxu0 }
 0x133   : > { %662 = vst [vmem:[%s345_s6] sm:$0xff] %v658_v17  ;;  %v659_v21 = vmax.f32 %v647_v18, 0.0  ;;  %v836_v22 = vadd.f32 %v835_v20, %v834_v19  ;;  %v837_v23 = vpop.f32.mrb[6].mxu0 }
 0x134   : > { %v838_v24 = vpop.f32.mrb[7].mxu0 }
 0x135   : > { %663 = vst [vmem:[%s345_s6 + $0x8] sm:$0xff] %v659_v21  ;;  %v603_v25 = vadd.f32 %v836_v22, %v408_v16  ;;  %v839_v26 = vadd.f32 %v838_v24, %v837_v23 }
 0x137   : > { %v652_v28 = vadd.f32 %v850_v1, %v603_v25  ;;  %v606_v29 = vadd.f32 %v839_v26, %v413_v27  ;;  %672 = sbr.rel (!%p982_p5) target bundleno = 326 (0x146), region = 77 }
 0x139   : > { %v660_v30 = vmax.f32 %v652_v28, 0.0  ;;  %v655_v31 = vadd.f32 %v851_v3, %v606_v29 }
 0x13a   : > { %v708_v33 = vld [vmem:[%s345_s6] sm:$0xff] (%p982_p5) }
 0x13b   : > { %664 = vst [vmem:[%s345_s6 + $0x10] sm:$0xff] %v660_v30  ;;  %v661_v32 = vmax.f32 %v655_v31, 0.0  ;;  %709 = vst [vmem:[%s674_s8] sm:$0xff] (%p982_p5), %v708_v33 }
 0x13c   : > { %v710_v34 = vld [vmem:[%s345_s6 + $0x8] sm:$0xff] (%p982_p5) }
 0x13d   : > { %665 = vst [vmem:[%s345_s6 + $0x18] sm:$0xff] %v661_v32  ;;  %711 = vst [vmem:[%s674_s8 + $0x10] sm:$0xff] (%p982_p5), %v710_v34 }
 0x142   : > { %v712_v35 = vld [vmem:[%s345_s6 + $0x10] sm:$0xff] }
 0x143   : > { %713 = vst [vmem:[%s674_s8 + $0x20] sm:$0xff] %v712_v35 }
 0x144   : > { %v714_v36 = vld [vmem:[%s345_s6 + $0x18] sm:$0xff] }
 0x145   : > { %715 = vst [vmem:[%s674_s8 + $0x30] sm:$0xff] %v714_v36 }
 0x146 PF: > { %p10_p10 = scmp.ge.s32.totalorder %s969_s16, 4   ;;  %s1149_s12 = smov %s925_s13 }
 0x147   : > { %s1150_s13 = smov %s980_s19  ;;  %s1151_s14 = smov %s969_s16 }
 0x148   :  { %12 = sbr.rel (!%p10_p10) target bundleno = 2 (0x2), region = 146 }

// kernel: model_forward.11
= control target key start
LH: loop header
LB: loop body
LE: loop exit
PB: predicated region body
PF: predicated region fallthrough
CT: control target
= control target key end

     0   :  { %s819_s12 = smov 0   ;;  %s821_s13 = smov 0   ;;  %s978_s0 = inlined_call_operand.vmem [shape: bf16[8,288], index: 0, kind: input, shape index: {}]   ;;  %s979_s1 = inlined_call_operand.vmem [shape: bf16[288,256], index: 1, kind: input, shape index: {}]   ;;  %s980_s2 = inlined_call_operand.vmem [shape: f32[8,1], index: 2, kind: input, shape index: {}]   ;;  %s981_s3 = inlined_call_operand.vmem [shape: f32[8,256], index: 3, kind: output, shape index: {}]  }
   0x1   :  { %s823_s14 = smov 0  }
   0x2 LB: > { %s657_s15 = sadd.s32 4294967295, %s794_s14   ;;  %s836_s16 = sadd.s32 1, %s794_s14   ;;  %s794_s14 = sphi %s823_s14, %s984_s14   ;;  %s790_s13 = sphi %s821_s13, %s983_s13   ;;  %s786_s12 = sphi %s819_s12, %s982_s12  }
   0x3   : > { %s38_s17 = ssub.s32 %s794_s14, %s836_s16  ;;  %s41_s18 = sadd.s32 1, %s790_s13 }
   0x4   : > { %p39_p0 = scmp.eq.s32.totalorder %s38_s17, 0  ;;  %p48_p1 = scmp.ne.s32.totalorder %s790_s13, %s786_s12 }
   0x5   : > { %p49_p2 = scmp.eq.s32.totalorder %s794_s14, 0  ;;  %p660_p4 = scmp.ge.s32.totalorder %s794_s14, 2 }
   0x6   : > { %s845_s19 = scalar_select %p39_p0, %s790_s13, %s41_s18  }
   0x7   : > { %p50_p3 = por %p49_p2, %p48_p1  ;;  %127 = sbr.rel (%p660_p4) target bundleno = 42 (0x2a), region = 24 }
   0xe   : > { %130 = sbr.rel (!%p50_p3) target bundleno = 42 (0x2a), region = 28  ;;  %s132_s20 = sand.u32 (%p50_p3), 1, %s790_s13  }
   0xf   : > { %s661_s21 = sshll.u32 (%p50_p3), %s794_s14, 2  ;;  %s721_s22 = smul.u32 (%p50_p3), 144, %s132_s20 }
  0x10   : > { %s853_s25 = scalar_lea.vmem (%p50_p3), %s979_s1, %s661_s21 }
  0x11   : > { %v152_v0 = vld [vmem:[%s853_s25] sm:$0xf] (%p50_p3)  ;;  %v154_v1 = vld [vmem:[%s853_s25 + $0x8] sm:$0xf] (%p50_p3)  ;;  %v156_v2 = vld [vmem:[%s853_s25 + $0x10] sm:$0xf] (%p50_p3) }
  0x12   : > { %v158_v3 = vld [vmem:[%s853_s25 + $0x18] sm:$0xf] (%p50_p3)  ;;  %v160_v4 = vld [vmem:[%s853_s25 + $0x20] sm:$0xf] (%p50_p3)  ;;  %s860_s26 = scalar_lea.vmem (%p50_p3), [#allocation2], %s721_s22 }
  0x13   : > { %153 = vst [vmem:[%s860_s26] sm:$0xf] (%p50_p3), %v152_v0  ;;  %155 = vst [vmem:[%s860_s26 + $0x4] sm:$0xf] (%p50_p3), %v154_v1  ;;  %v162_v5 = vld [vmem:[%s853_s25 + $0x28] sm:$0xf] (%p50_p3) }
  0x14   : > { %157 = vst [vmem:[%s860_s26 + $0x8] sm:$0xf] (%p50_p3), %v156_v2  ;;  %159 = vst [vmem:[%s860_s26 + $0xc] sm:$0xf] (%p50_p3), %v158_v3  ;;  %v164_v6 = vld [vmem:[%s853_s25 + $0x30] sm:$0xf] (%p50_p3) }
  0x15   : > { %161 = vst [vmem:[%s860_s26 + $0x10] sm:$0xf] %v160_v4  ;;  %v166_v7 = vld [vmem:[%s853_s25 + $0x38] sm:$0xf]  ;;  %163 = vst [vmem:[%s860_s26 + $0x14] sm:$0xf] %v162_v5 }
  0x16   : > { %165 = vst [vmem:[%s860_s26 + $0x18] sm:$0xf] %v164_v6  ;;  %167 = vst [vmem:[%s860_s26 + $0x1c] sm:$0xf] %v166_v7  ;;  %v168_v8 = vld [vmem:[%s853_s25 + $0x40] sm:$0xf] }
  0x17   : > { %v170_v9 = vld [vmem:[%s853_s25 + $0x48] sm:$0xf]  ;;  %v172_v10 = vld [vmem:[%s853_s25 + $0x50] sm:$0xf]  ;;  %169 = vst [vmem:[%s860_s26 + $0x20] sm:$0xf] %v168_v8 }
  0x18   : > { %171 = vst [vmem:[%s860_s26 + $0x24] sm:$0xf] %v170_v9  ;;  %173 = vst [vmem:[%s860_s26 + $0x28] sm:$0xf] %v172_v10  ;;  %v174_v11 = vld [vmem:[%s853_s25 + $0x58] sm:$0xf] }
  0x19   : > { %v176_v12 = vld [vmem:[%s853_s25 + $0x60] sm:$0xf]  ;;  %v178_v13 = vld [vmem:[%s853_s25 + $0x68] sm:$0xf]  ;;  %175 = vst [vmem:[%s860_s26 + $0x2c] sm:$0xf] %v174_v11 }
  0x1a   : > { %177 = vst [vmem:[%s860_s26 + $0x30] sm:$0xf] %v176_v12  ;;  %179 = vst [vmem:[%s860_s26 + $0x34] sm:$0xf] %v178_v13  ;;  %v180_v14 = vld [vmem:[%s853_s25 + $0x70] sm:$0xf] }
  0x1b   : > { %v182_v15 = vld [vmem:[%s853_s25 + $0x78] sm:$0xf]  ;;  %v184_v16 = vld [vmem:[%s853_s25 + $0x80] sm:$0xf]  ;;  %181 = vst [vmem:[%s860_s26 + $0x38] sm:$0xf] %v180_v14 }
  0x1c   : > { %183 = vst [vmem:[%s860_s26 + $0x3c] sm:$0xf] %v182_v15  ;;  %185 = vst [vmem:[%s860_s26 + $0x40] sm:$0xf] %v184_v16  ;;  %v186_v17 = vld [vmem:[%s853_s25 + $0x88] sm:$0xf] }
  0x1d   : > { %v188_v18 = vld [vmem:[%s853_s25 + $0x90] sm:$0xf]  ;;  %v190_v19 = vld [vmem:[%s853_s25 + $0x98] sm:$0xf]  ;;  %187 = vst [vmem:[%s860_s26 + $0x44] sm:$0xf] %v186_v17 }
  0x1e   : > { %189 = vst [vmem:[%s860_s26 + $0x48] sm:$0xf] %v188_v18  ;;  %191 = vst [vmem:[%s860_s26 + $0x4c] sm:$0xf] %v190_v19  ;;  %v192_v20 = vld [vmem:[%s853_s25 + $0xa0] sm:$0xf] }
  0x1f   : > { %v194_v21 = vld [vmem:[%s853_s25 + $0xa8] sm:$0xf]  ;;  %v196_v22 = vld [vmem:[%s853_s25 + $0xb0] sm:$0xf]  ;;  %193 = vst [vmem:[%s860_s26 + $0x50] sm:$0xf] %v192_v20 }
  0x20   : > { %195 = vst [vmem:[%s860_s26 + $0x54] sm:$0xf] %v194_v21  ;;  %197 = vst [vmem:[%s860_s26 + $0x58] sm:$0xf] %v196_v22  ;;  %v198_v23 = vld [vmem:[%s853_s25 + $0xb8] sm:$0xf] }
  0x21   : > { %v200_v24 = vld [vmem:[%s853_s25 + $0xc0] sm:$0xf]  ;;  %v202_v25 = vld [vmem:[%s853_s25 + $0xc8] sm:$0xf]  ;;  %199 = vst [vmem:[%s860_s26 + $0x5c] sm:$0xf] %v198_v23 }
  0x22   : > { %201 = vst [vmem:[%s860_s26 + $0x60] sm:$0xf] %v200_v24  ;;  %203 = vst [vmem:[%s860_s26 + $0x64] sm:$0xf] %v202_v25  ;;  %v204_v26 = vld [vmem:[%s853_s25 + $0xd0] sm:$0xf] }
  0x23   : > { %v206_v27 = vld [vmem:[%s853_s25 + $0xd8] sm:$0xf]  ;;  %v208_v28 = vld [vmem:[%s853_s25 + $0xe0] sm:$0xf]  ;;  %205 = vst [vmem:[%s860_s26 + $0x68] sm:$0xf] %v204_v26 }
  0x24   : > { %207 = vst [vmem:[%s860_s26 + $0x6c] sm:$0xf] %v206_v27  ;;  %209 = vst [vmem:[%s860_s26 + $0x70] sm:$0xf] %v208_v28  ;;  %v210_v29 = vld [vmem:[%s853_s25 + $0xe8] sm:$0xf] }
  0x25   : > { %v212_v30 = vld [vmem:[%s853_s25 + $0xf0] sm:$0xf]  ;;  %v214_v31 = vld [vmem:[%s853_s25 + $0xf8] sm:$0xf]  ;;  %211 = vst [vmem:[%s860_s26 + $0x74] sm:$0xf] %v210_v29 }
  0x26   : > { %213 = vst [vmem:[%s860_s26 + $0x78] sm:$0xf] %v212_v30  ;;  %215 = vst [vmem:[%s860_s26 + $0x7c] sm:$0xf] %v214_v31  ;;  %v216_v32 = vld [vmem:[%s853_s25 + $0x100] sm:$0xf] }
  0x27   : > { %v218_v33 = vld [vmem:[%s853_s25 + $0x108] sm:$0xf]  ;;  %v220_v34 = vld [vmem:[%s853_s25 + $0x110] sm:$0xf]  ;;  %217 = vst [vmem:[%s860_s26 + $0x80] sm:$0xf] %v216_v32 }
  0x28   : > { %219 = vst [vmem:[%s860_s26 + $0x84] sm:$0xf] %v218_v33  ;;  %221 = vst [vmem:[%s860_s26 + $0x88] sm:$0xf] %v220_v34  ;;  %v222_v35 = vld [vmem:[%s853_s25 + $0x118] sm:$0xf] }
  0x29   : > { %223 = vst [vmem:[%s860_s26 + $0x8c] sm:$0xf] %v222_v35 }
  0x2a PF: > { %p662_p5 = scmp.ge.s32.totalorder %s794_s14, 1  ;;  %p317_p6 = scmp.lt.s32.totalorder %s794_s14, 3 }
  0x2c   : > { %p318_p7 = pnand %p662_p5, %p317_p6 }
  0x2d   : > { %s324_s27 = sand.u32 (!%p318_p7), 1, %s786_s12   ;;  %v351_v36 = vld [vmem:[%s978_s0] sm:$0xff] (!%p318_p7)  ;;  %v796_v37 = vmov (!%p318_p7), 0.0   ;;  %vm797_vm0 = vmmov (!%p318_p7), 0   ;;  %v798_v40 = vmov (!%p318_p7), 0   ;;  %vm513_vm1 = vcmask (!%p318_p7), 261120  }
  0x2e   : > { %321 = sbr.rel (%p318_p7) target bundleno = 303 (0x12f), region = 69  ;;  %713 = vmatprep.subr.bf16.mxu1 (!%p318_p7), %v796_v37  ;;  %v665_v38 = vcombine.high (!%p318_p7), %v351_v36, %v351_v36  ;;  %717 = vmatprep.mubr.msk.bf16.mxu1 (!%p318_p7), %vm797_vm0, %v796_v37  ;;  %v389_v39 = vld [vmem:[%s980_s2] sm:$0xff] (!%p318_p7)  ;;  %v771_v55 = vld [vmem:[%s978_s0 + $0x8] ss:$0 sps:$4 sm:$0xff] (!%p318_p7)   ;;  %v664_v60 = vcombine.low (!%p318_p7), %v351_v36, %v351_v36  ;;  %p346_p8 = scmp.lt.s32.totalorder (!%p318_p7), %s657_s15, 1 }
  0x2f   : > { %s722_s30 = smul.u32 (!%p318_p7), 144, %s324_s27  ;;  %750 = vset.pattern.permute.xlu0 (!%p318_p7), %v798_v40 }
  0x30   : > { %549 = vmatprep.mubr.bf16.mxu0 (!%p318_p7), %v665_v38  ;;  %392 = vperm.xlu0 (!%p318_p7), %750, %v389_v39  }
  0x31   : > { %s938_s6 = scalar_lea.vmem (!%p318_p7), [#allocation2], %s722_s30 }
  0x32   : > { %v751_v41 = vld [vmem:[%s938_s6 + $0x40] sm:$0xff] (!%p318_p7)   ;;  %v753_v43 = vld [vmem:[%s938_s6 + $0x48] sm:$0xff] (!%p318_p7)   ;;  %v755_v45 = vld [vmem:[%s938_s6 + $0x50] sm:$0xff] (!%p318_p7)  }
  0x33   : > { %v752_v42 = vld [vmem:[%s938_s6] sm:$0xff] (!%p318_p7)   ;;  %688 = vmatprep.subr.bf16.mxu0 (!%p318_p7), %v751_v41  ;;  %v754_v44 = vld [vmem:[%s938_s6 + $0x8] sm:$0xff] (!%p318_p7)   ;;  %v756_v46 = vld [vmem:[%s938_s6 + $0x10] sm:$0xff] (!%p318_p7)  }
  0x34   : > { %689 = vmatpush3.bf16.msra.mxu0 (!%p318_p7), %v752_v42  ;;  %v757_v47 = vld [vmem:[%s938_s6 + $0x58] sm:$0xff] (!%p318_p7)   ;;  %v759_v49 = vld [vmem:[%s938_s6 + $0x60] sm:$0xff] (!%p318_p7)   ;;  %v761_v52 = vld [vmem:[%s938_s6 + $0x68] sm:$0xff] (!%p318_p7)  }
  0x35   : > { %690 = vmatprep.subr.bf16.mxu0 %v753_v43  ;;  %v758_v48 = vld [vmem:[%s938_s6 + $0x18] sm:$0xff]   ;;  %v765_v50 = vld [vmem:[%s938_s6 + $0x80] sm:$0xff]   ;;  %v770_v53 = vld [vmem:[%s938_s6 + $0x88] sm:$0xff]   ;;  %s986_s15 = smov (!%p346_p8, %s657_s15), 1 }
  0x36   : > { %v760_v51 = vld [vmem:[%s938_s6 + $0x20] sm:$0xff]   ;;  %714 = vmatpush3.bf16.msra.mxu1 %v765_v50  ;;  %v762_v54 = vld [vmem:[%s938_s6 + $0x28] sm:$0xff]   ;;  %v763_v56 = vld [vmem:[%s938_s6 + $0x70] sm:$0xff]   ;;  %s663_s9 = sshll.u32 %s986_s15, 3 }
  0x37   : > { %715 = vmatprep.subr.bf16.mxu1 %v796_v37  ;;  %v764_v57 = vld [vmem:[%s938_s6 + $0x30] sm:$0xff]   ;;  %v766_v58 = vld [vmem:[%s938_s6 + $0x78] sm:$0xff]   ;;  %s349_s12 = scalar_lea.vmem %s981_s3, %s663_s9 }
  0x38   : > { %691 = vmatpush3.bf16.msra.mxu0 %v754_v44  ;;  %v767_v59 = vld [vmem:[%s938_s6 + $0x38] sm:$0xff]  }
  0x39   : > { %692 = vmatprep.subr.bf16.mxu0 %v755_v45 }
  0x3a   : > { %716 = vmatpush3.bf16.msra.mxu1 %v770_v53 }
  0x3c   : > { %693 = vmatpush3.bf16.msra.mxu0 %v756_v46 }
  0x3d   : > { %694 = vmatprep.subr.bf16.mxu0 %v757_v47  ;;  %718 = vmatmul.mubr.msk.bf16.vlgmr.msra.gmra.mrb[0].mxu1 %vm513_vm1, %v771_v55 }
  0x40   : > { %695 = vmatpush3.bf16.msra.mxu0 %v758_v48 }
  0x41   : > { %696 = vmatprep.subr.bf16.mxu0 %v759_v49 }
  0x44   : > { %697 = vmatpush3.bf16.msra.mxu0 %v760_v51 }
  0x45   : > { %698 = vmatprep.subr.bf16.mxu0 %v761_v52 }
  0x48   : > { %699 = vmatpush3.bf16.msra.mxu0 %v762_v54 }
  0x49   : > { %700 = vmatprep.subr.bf16.mxu0 %v763_v56 }
  0x4c   : > { %701 = vmatpush3.bf16.msra.mxu0 %v764_v57 }
  0x4d   : > { %702 = vmatprep.subr.bf16.mxu0 %v766_v58 }
  0x50   : > { %703 = vmatpush3.bf16.msra.mxu0 %v767_v59 }
  0x53   : > { %550 = vmatmul.mubr.bf16.vlgmr.msra.gmra.mrb[0].mxu0 %v664_v60 }
  0xaf   : > { %v393_v3 = vpop.permute.xlu0 %392 }
 0x110   : > { %v591_v61 = vpop.f32.mrb[0].mxu1 }
 0x111   : > { %v719_v62 = vpop.f32.mrb[1].mxu1 }
 0x112   : > { %v594_v63 = vpop.f32.mrb[2].mxu1 }
 0x113   : > { %v720_v0 = vpop.f32.mrb[3].mxu1 }
 0x126   : > { %v704_v1 = vpop.f32.mrb[0].mxu0 }
 0x127   : > { %v705_v2 = vpop.f32.mrb[1].mxu0 }
 0x128   : > { %v706_v4 = vadd.f32 %v705_v2, %v704_v1  ;;  %v707_v5 = vpop.f32.mrb[2].mxu0 }
 0x129   : > { %v708_v6 = vpop.f32.mrb[3].mxu0 }
 0x12a   : > { %v552_v7 = vadd.f32 %v706_v4, %v393_v3 }
 0x12c   : > { %v592_v8 = vadd.f32 %v591_v61, %v552_v7 }
 0x12e   : > { %597 = vst [vmem:[%s349_s12] sm:$0xff] %v592_v8 }
 0x12f PF: > { %p10_p9 = scmp.ge.s32.totalorder %s836_s16, 4   ;;  %s982_s12 = smov %s790_s13 }
 0x130   : > { %s983_s13 = smov %s845_s19  ;;  %s984_s14 = smov %s836_s16 }
 0x131   :  { %12 = sbr.rel (!%p10_p9) target bundleno = 2 (0x2), region = 108 }

// kernel: model_forward.12
= control target key start
LH: loop header
LB: loop body
LE: loop exit
PB: predicated region body
PF: predicated region fallthrough
CT: control target
= control target key end

     0   :  { %v214_v1 = vmov 0   ;;  %vm101_vm0 = vcmask 785408   ;;  %s285_s1 = inlined_call_operand.vmem [shape: bf16[96,128], index: 1, kind: input, shape index: {}]   ;;  %s286_s0 = inlined_call_operand.vmem [shape: bf16[32,96], index: 0, kind: input, shape index: {}]   ;;  %s287_s2 = inlined_call_operand.vmem [shape: f32[32,1], index: 2, kind: input, shape index: {}]   ;;  %s288_s3 = inlined_call_operand.vmem [shape: f32[32,128], index: 3, kind: output, shape index: {}]  }
   0x1   :  { %v206_v0 = vld [vmem:[%s285_s1] sm:$0xff]   ;;  %205 = vset.pattern.permute.xlu1 %v214_v1  ;;  %204 = vset.pattern.permute.xlu0 %v214_v1  ;;  %v207_v2 = vld [vmem:[%s285_s1 + $0x8] sm:$0xff]   ;;  %v208_v3 = vld [vmem:[%s285_s1 + $0x10] sm:$0xff]  }
   0x2   :  { %187 = vmatprep.subr.bf16.mxu0 %v206_v0  ;;  %v212_v4 = vld [vmem:[%s286_s0] sm:$0xff]   ;;  %v209_v5 = vld [vmem:[%s285_s1 + $0x18] sm:$0xff]   ;;  %v33_v6 = vld [vmem:[%s287_s2 + $0x10] sm:$0xff] }
   0x3   :  { %188 = vmatpush3.bf16.msra.mxu0 %v206_v0  ;;  %199 = vmatprep.mubr.msk.bf16.mxu0 %vm101_vm0, %v212_v4  ;;  %v31_v7 = vld [vmem:[%s287_s2] sm:$0xff]  ;;  %v34_v8 = vld [vmem:[%s287_s2 + $0x18] sm:$0xff]  ;;  %v32_v9 = vld [vmem:[%s287_s2 + $0x8] sm:$0xff] }
   0x4   :  { %189 = vmatprep.subr.bf16.mxu0 %v207_v2  ;;  %47 = vperm.xlu1 %205, %v33_v6   ;;  %v210_v10 = vld [vmem:[%s285_s1 + $0x20] sm:$0xff]   ;;  %v211_v11 = vld [vmem:[%s285_s1 + $0x28] sm:$0xff]  }
   0x5   :  { %37 = vperm.xlu0 %204, %v31_v7   ;;  %v213_v12 = vld [vmem:[%s286_s0 + $0x8] sm:$0xff]  }
   0x7   :  { %190 = vmatpush3.bf16.msra.mxu0 %v207_v2 }
   0x8   :  { %191 = vmatprep.subr.bf16.mxu0 %v208_v3  ;;  %52 = vperm.xlu1 %205, %v34_v8  }
   0x9   :  { %42 = vperm.xlu0 %204, %v32_v9  }
   0xb   :  { %192 = vmatpush3.bf16.msra.mxu0 %v208_v3 }
   0xc   :  { %193 = vmatprep.subr.bf16.mxu0 %v209_v5 }
   0xf   :  { %194 = vmatpush3.bf16.msra.mxu0 %v209_v5 }
  0x10   :  { %195 = vmatprep.subr.bf16.mxu0 %v210_v10 }
  0x13   :  { %196 = vmatpush3.bf16.msra.mxu0 %v210_v10 }
  0x14   :  { %197 = vmatprep.subr.bf16.mxu0 %v211_v11 }
  0x17   :  { %198 = vmatpush3.bf16.msra.mxu0 %v211_v11 }
  0x1a   :  { %200 = vmatmul.mubr.msk.bf16.vlgmr.msra.gmra.mrb[0].mxu0 %vm101_vm0, %v213_v12 }
  0x83   :  { %v48_v13 = vpop.permute.xlu1 %47 }
  0x84   :  { %v38_v14 = vpop.permute.xlu0 %37 }
  0x87   :  { %v53_v18 = vpop.permute.xlu1 %52 }
  0x88   :  { %v43_v21 = vpop.permute.xlu0 %42 }
  0xed   :  { %v201_v15 = vpop.f32.mrb[0].mxu0 }
  0xee   :  { %v151_v16 = vadd.f32 %v201_v15, %v48_v13  ;;  %v142_v17 = vpop.f32.mrb[1].mxu0 }
  0xef   :  { %v143_v19 = vadd.f32 %v142_v17, %v38_v14  ;;  %v202_v20 = vpop.f32.mrb[2].mxu0 }
  0xf0   :  { %v159_v22 = vmax.f32 %v151_v16, 0.0  ;;  %v154_v23 = vadd.f32 %v202_v20, %v53_v18  ;;  %v145_v24 = vpop.f32.mrb[3].mxu0 }
  0xf1   :  { %v157_v25 = vmax.f32 %v143_v19, 0.0  ;;  %v146_v26 = vadd.f32 %v145_v24, %v43_v21 }
  0xf2   :  { %163 = vst [vmem:[%s288_s3 + $0x10] sm:$0xff] %v159_v22  ;;  %v160_v27 = vmax.f32 %v154_v23, 0.0 }
  0xf3   :  { %161 = vst [vmem:[%s288_s3] sm:$0xff] %v157_v25  ;;  %v158_v28 = vmax.f32 %v146_v26, 0.0 }
  0xf4   :  { %164 = vst [vmem:[%s288_s3 + $0x18] sm:$0xff] %v160_v27 }
  0xf5   :  { %162 = vst [vmem:[%s288_s3 + $0x8] sm:$0xff] %v158_v28 }

// kernel: model_forward.13
= control target key start
LH: loop header
LB: loop body
LE: loop exit
PB: predicated region body
PF: predicated region fallthrough
CT: control target
= control target key end

     0   :  { %v107_v0 = vmov 0.0   ;;  %vm108_vm0 = vmmov 0   ;;  %v109_v2 = vmov 0   ;;  %vm38_vm1 = vcmask 261120   ;;  %s145_s1 = inlined_call_operand.vmem [shape: bf16[32,128], index: 1, kind: input, shape index: {}]   ;;  %s146_s2 = inlined_call_operand.vmem [shape: f32[8,1], index: 2, kind: input, shape index: {}]   ;;  %s147_s0 = inlined_call_operand.vmem [shape: bf16[8,32], index: 0, kind: input, shape index: {}]   ;;  %s148_s3 = inlined_call_operand.vmem [shape: f32[8,128], index: 3, kind: output, shape index: {}]  }
   0x1   :  { %93 = vmatprep.subr.bf16.mxu0 %v107_v0  ;;  %v105_v1 = vld [vmem:[%s145_s1] sm:$0xff]   ;;  %97 = vmatprep.mubr.msk.bf16.mxu0 %vm108_vm0, %v107_v0  ;;  %v106_v3 = vld [vmem:[%s145_s1 + $0x8] sm:$0xff]  }
   0x2   :  { %104 = vset.pattern.permute.xlu0 %v109_v2  ;;  %94 = vmatpush3.bf16.msra.mxu0 %v105_v1  ;;  %v20_v4 = vld [vmem:[%s146_s2] sm:$0xff] }
   0x3   :  { %95 = vmatprep.subr.bf16.mxu0 %v107_v0  ;;  %23 = vperm.xlu0 %104, %v20_v4   ;;  %v15_v5 = vld [vmem:[%s147_s0] sm:$0xf] }
   0x6   :  { %96 = vmatpush3.bf16.msra.mxu0 %v106_v3 }
   0x9   :  { %98 = vmatmul.mubr.msk.bf16.vlgmr.msra.gmra.mrb[0].mxu0 %vm38_vm1, %v15_v5 }
  0x82   :  { %v24_v6 = vpop.permute.xlu0 %23 }
  0xdc   :  { %v76_v7 = vpop.f32.mrb[0].mxu0 }
  0xdd   :  { %v77_v8 = vadd.f32 %v76_v7, %v24_v6  ;;  %v99_v9 = vpop.f32.mrb[1].mxu0 }
  0xde   :  { %v79_v10 = vpop.f32.mrb[2].mxu0 }
  0xdf   :  { %82 = vst [vmem:[%s148_s3] sm:$0xff] %v77_v8  ;;  %v100_v11 = vpop.f32.mrb[3].mxu0 }

// kernel: model_forward.14
= control target key start
LH: loop header
LB: loop body
LE: loop exit
PB: predicated region body
PF: predicated region fallthrough
CT: control target
= control target key end

     0   :  { %v53_v16 = vlaneseq  ;;  %s256_s2 = inlined_call_operand.vmem [shape: f32[2,1,256], index: 2, kind: input, shape index: {}]   ;;  %s257_s3 = inlined_call_operand.vmem [shape: f32[2,1,256], index: 3, kind: input, shape index: {}]   ;;  %s258_s0 = inlined_call_operand.vmem [shape: f32[2,3,256], index: 0, kind: input, shape index: {}]   ;;  %s259_s1 = inlined_call_operand.vmem [shape: f32[2,3,256], index: 1, kind: input, shape index: {}]   ;;  %s260_s4 = inlined_call_operand.vmem [shape: f32[2,3,256], index: 4, kind: output, shape index: {}]  }
   0x1   :  { %v17_v0 = vld [vmem:[%s256_s2] sm:$0x3]  ;;  %v18_v4 = vld [vmem:[%s256_s2 + $0x2] sm:$0x3]  ;;  %v50_v36 = vld [vmem:[%s258_s0 + $0x8] sm:$0x77] }
   0x2   :  { %v33_v1 = vld [vmem:[%s257_s3] sm:$0x3]  ;;  %v169_v2 = vmul.f32 -1.442695, %v17_v0  ;;  %v34_v5 = vld [vmem:[%s257_s3 + $0x2] sm:$0x3]  ;;  %v76_v44 = vcombine.high %v50_v36, %v50_v36 }
   0x3   :  { %v171_v3 = vmul.f32 -1.442695, %v33_v1  ;;  %v170_v6 = vmul.f32 -1.442695, %v18_v4  ;;  %v172_v7 = vmul.f32 -1.442695, %v34_v5 }
   0x4   :  { %177 = vpow2.f32 %v169_v2  ;;  %v54_v18 = vshrl.u32 %v53_v16, 7  ;;  %v49_v29 = vld [vmem:[%s258_s0] sm:$0x77]  ;;  %v84_v40 = vld [vmem:[%s259_s1 + $0x8] sm:$0x77] }
   0x5   :  { %179 = vpow2.f32 %v171_v3  ;;  %v83_v31 = vld [vmem:[%s259_s1] sm:$0x77]  ;;  %v75_v38 = vcombine.high %v49_v29, %v49_v29  ;;  %v110_v46 = vcombine.high %v84_v40, %v84_v40 }
   0x6   :  { %181 = vpow2.f32 %v170_v6  ;;  %v55_v24 = vsub.s32 0, %v54_v18  ;;  %v59_v25 = vsub.s32 1, %v54_v18  ;;  %v109_v42 = vcombine.high %v83_v31, %v83_v31 }
   0x7   :  { %183 = vpow2.f32 %v172_v7 }
   0xe   :  { %v178_v8 = vpop.eup %177 }
   0xf   :  { %v180_v9 = vpop.eup %179  ;;  %v25_v10 = vadd.f32 1.0, %v178_v8 }
  0x10   :  { %v41_v11 = vadd.f32 1.0, %v180_v9  ;;  %v182_v12 = vpop.eup %181 }
  0x11   :  { %185 = vrcp.f32 %v25_v10  ;;  %v184_v13 = vpop.eup %183  ;;  %v26_v14 = vadd.f32 1.0, %v182_v12 }
  0x12   :  { %187 = vrcp.f32 %v41_v11  ;;  %v42_v15 = vadd.f32 1.0, %v184_v13 }
  0x13   :  { %189 = vrcp.f32 %v26_v14 }
  0x14   :  { %191 = vrcp.f32 %v42_v15 }
  0x1b   :  { %v186_v17 = vpop.eup %185 }
  0x1c   :  { %v188_v19 = vpop.eup %187  ;;  %v31_v20 = vmul.f32 0.5, %v186_v17 }
  0x1d   :  { %v47_v21 = vmul.f32 0.5, %v188_v19  ;;  %v190_v22 = vpop.eup %189 }
  0x1e   :  { %v192_v23 = vpop.eup %191  ;;  %v32_v27 = vmul.f32 0.5, %v190_v22  ;;  %v56_v33 = vrot.slane %v31_v20, %v55_v24  ;;  %v60_v37 = vrot.slane %v31_v20, %v59_v25 }
  0x1f   :  { %v121_v26 = vadd.f32 %v47_v21, %v31_v20  ;;  %v48_v28 = vmul.f32 0.5, %v192_v23  ;;  %v90_v39 = vrot.slane %v47_v21, %v55_v24  ;;  %v94_v41 = vrot.slane %v47_v21, %v59_v25 }
  0x20   :  { %v79_v45 = vmul.f32 %v56_v33, %v49_v29  ;;  %v80_v49 = vmul.f32 %v75_v38, %v60_v37  ;;  %v64_v51 = vrot.slane %v32_v27, %v55_v24  ;;  %v68_v54 = vrot.slane %v32_v27, %v59_v25 }
  0x21   :  { %v123_v30 = vadd.f32 1e-06, %v121_v26  ;;  %v122_v32 = vadd.f32 %v48_v28, %v32_v27  ;;  %v113_v50 = vmul.f32 %v90_v39, %v83_v31  ;;  %v98_v52 = vrot.slane %v48_v28, %v55_v24 }
  0x22   :  { %v114_v53 = vmul.f32 %v109_v42, %v94_v41  ;;  %v102_v55 = vrot.slane %v48_v28, %v59_v25  ;;  %v81_v57 = vmul.f32 %v64_v51, %v50_v36  ;;  %v82_v60 = vmul.f32 %v76_v44, %v68_v54 }
  0x23   :  { %v130_v34 = vrot.slane %v123_v30, %v55_v24  ;;  %v134_v35 = vrot.slane %v123_v30, %v59_v25  ;;  %v124_v43 = vadd.f32 1e-06, %v122_v32  ;;  %v117_v56 = vadd.f32 %v113_v50, %v79_v45 }
  0x24   :  { %v115_v58 = vmul.f32 %v98_v52, %v84_v40  ;;  %v118_v59 = vadd.f32 %v114_v53, %v80_v49  ;;  %v116_v61 = vmul.f32 %v110_v46, %v102_v55 }
  0x25   :  { %193 = vrcp.f32 %v130_v34  ;;  %v138_v47 = vrot.slane %v124_v43, %v55_v24  ;;  %v142_v48 = vrot.slane %v124_v43, %v59_v25 }
  0x26   :  { %195 = vrcp.f32 %v134_v35  ;;  %v119_v1 = vadd.f32 %v115_v58, %v81_v57  ;;  %v120_v3 = vadd.f32 %v116_v61, %v82_v60 }
  0x27   :  { %197 = vrcp.f32 %v138_v47 }
  0x28   :  { %199 = vrcp.f32 %v142_v48 }
  0x2f   :  { %v194_v62 = vpop.eup %193 }
  0x30   :  { %v196_v63 = vpop.eup %195  ;;  %v148_v0 = vmul.f32 %v194_v62, %v117_v56 }
  0x31   :  { %v150_v2 = vmul.f32 %v196_v63, %v118_v59  ;;  %v198_v4 = vpop.eup %197 }
  0x32   :  { %v200_v6 = vpop.eup %199  ;;  %v152_v7 = vmul.f32 %v198_v4, %v119_v1 }
  0x33   :  { %v159_v5 = vcombine.low %v148_v0, %v150_v2  ;;  %v154_v8 = vmul.f32 %v200_v6, %v120_v3 }
  0x35   :  { %163 = vst [vmem:[%s260_s4] sm:$0x77] %v159_v5  ;;  %v160_v9 = vcombine.low %v152_v7, %v154_v8 }
  0x37   :  { %164 = vst [vmem:[%s260_s4 + $0x8] sm:$0x77] %v160_v9 }

// kernel: model_forward.15
= control target key start
LH: loop header
LB: loop body
LE: loop exit
PB: predicated region body
PF: predicated region fallthrough
CT: control target
= control target key end

     0   :  { %s536_s12 = smov 0   ;;  %s538_s13 = smov 0   ;;  %s596_s0 = inlined_call_operand.vmem [shape: bf16[8,96], index: 0, kind: input, shape index: {}]   ;;  %s597_s1 = inlined_call_operand.vmem [shape: bf16[96,512], index: 1, kind: input, shape index: {}]   ;;  %s598_s2 = inlined_call_operand.vmem [shape: f32[8,1], index: 2, kind: input, shape index: {}]   ;;  %s599_s3 = inlined_call_operand.vmem [shape: f32[8,512], index: 3, kind: output, shape index: {}]  }
   0x1   :  { %s540_s14 = smov 0  }
   0x2 LB: > { %s414_s15 = sadd.s32 4294967295, %s511_s14   ;;  %s553_s16 = sadd.s32 1, %s511_s14   ;;  %s511_s14 = sphi %s540_s14, %s602_s14   ;;  %s507_s13 = sphi %s538_s13, %s601_s13   ;;  %s503_s12 = sphi %s536_s12, %s600_s12  }
   0x3   : > { %s38_s17 = ssub.s32 %s511_s14, %s553_s16  ;;  %s41_s18 = sadd.s32 1, %s507_s13 }
   0x4   : > { %p39_p0 = scmp.eq.s32.totalorder %s38_s17, 0  ;;  %p48_p1 = scmp.ne.s32.totalorder %s507_s13, %s503_s12 }
   0x5   : > { %p49_p2 = scmp.eq.s32.totalorder %s511_s14, 0  ;;  %p417_p4 = scmp.ge.s32.totalorder %s511_s14, 4 }
   0x6   : > { %s562_s19 = scalar_select %p39_p0, %s507_s13, %s41_s18  }
   0x7   : > { %p50_p3 = por %p49_p2, %p48_p1  ;;  %127 = sbr.rel (%p417_p4) target bundleno = 26 (0x1a), region = 24 }
   0xe   : > { %130 = sbr.rel (!%p50_p3) target bundleno = 26 (0x1a), region = 28  ;;  %s132_s20 = sand.u32 (%p50_p3), 1, %s507_s13  }
   0xf   : > { %s418_s21 = sshll.u32 (%p50_p3), %s511_s14, 2  ;;  %s453_s22 = smul.u32 (%p50_p3), 48, %s132_s20 }
  0x10   : > { %s136_s25 = scalar_lea.vmem (%p50_p3), %s597_s1, %s418_s21 }
  0x11   : > { %v152_v0 = vld [vmem:[%s136_s25] sm:$0xf] (%p50_p3)  ;;  %v154_v1 = vld [vmem:[%s136_s25 + $0x10] sm:$0xf] (%p50_p3)  ;;  %s134_s26 = scalar_lea.vmem (%p50_p3), [#allocation2], %s453_s22 }
  0x12   : > { %v156_v2 = vld [vmem:[%s136_s25 + $0x20] sm:$0xf] (%p50_p3)  ;;  %v158_v3 = vld [vmem:[%s136_s25 + $0x30] sm:$0xf] (%p50_p3)  ;;  %153 = vst [vmem:[%s134_s26] sm:$0xf] (%p50_p3), %v152_v0 }
  0x13   : > { %v160_v4 = vld [vmem:[%s136_s25 + $0x40] sm:$0xf] (%p50_p3)  ;;  %155 = vst [vmem:[%s134_s26 + $0x4] sm:$0xf] (%p50_p3), %v154_v1  ;;  %157 = vst [vmem:[%s134_s26 + $0x8] sm:$0xf] (%p50_p3), %v156_v2 }
  0x14   : > { %159 = vst [vmem:[%s134_s26 + $0xc] sm:$0xf] (%p50_p3), %v158_v3  ;;  %161 = vst [vmem:[%s134_s26 + $0x10] sm:$0xf] (%p50_p3), %v160_v4  ;;  %v162_v5 = vld [vmem:[%s136_s25 + $0x50] sm:$0xf] (%p50_p3) }
  0x15   : > { %v164_v6 = vld [vmem:[%s136_s25 + $0x60] sm:$0xf]  ;;  %v166_v7 = vld [vmem:[%s136_s25 + $0x70] sm:$0xf]  ;;  %163 = vst [vmem:[%s134_s26 + $0x14] sm:$0xf] %v162_v5 }
  0x16   : > { %165 = vst [vmem:[%s134_s26 + $0x18] sm:$0xf] %v164_v6  ;;  %167 = vst [vmem:[%s134_s26 + $0x1c] sm:$0xf] %v166_v7  ;;  %v168_v8 = vld [vmem:[%s136_s25 + $0x80] sm:$0xf] }
  0x17   : > { %v170_v9 = vld [vmem:[%s136_s25 + $0x90] sm:$0xf]  ;;  %v172_v10 = vld [vmem:[%s136_s25 + $0xa0] sm:$0xf]  ;;  %169 = vst [vmem:[%s134_s26 + $0x20] sm:$0xf] %v168_v8 }
  0x18   : > { %171 = vst [vmem:[%s134_s26 + $0x24] sm:$0xf] %v170_v9  ;;  %173 = vst [vmem:[%s134_s26 + $0x28] sm:$0xf] %v172_v10  ;;  %v174_v11 = vld [vmem:[%s136_s25 + $0xb0] sm:$0xf] }
  0x19   : > { %175 = vst [vmem:[%s134_s26 + $0x2c] sm:$0xf] %v174_v11 }
  0x1a PF: > { %p419_p5 = scmp.ge.s32.totalorder %s511_s14, 1  ;;  %p221_p6 = scmp.lt.s32.totalorder %s511_s14, 5 }
  0x1c   : > { %p222_p7 = pnand %p419_p5, %p221_p6 }
  0x1d   : > { %s228_s27 = sand.u32 (!%p222_p7), 1, %s503_s12   ;;  %v513_v12 = vmov (!%p222_p7), 0.0   ;;  %vm514_vm0 = vmmov (!%p222_p7), 0   ;;  %v268_v13 = vld [vmem:[%s598_s2] sm:$0xff] (!%p222_p7)  ;;  %v515_v14 = vmov (!%p222_p7), 0   ;;  %vm310_vm1 = vcmask (!%p222_p7), 785408  }
  0x1e   : > { %225 = sbr.rel (%p222_p7) target bundleno = 273 (0x111), region = 69  ;;  %437 = vmatprep.subr.bf16.mxu0 (!%p222_p7), %v513_v12  ;;  %449 = vmatprep.mubr.msk.bf16.mxu0 (!%p222_p7), %vm514_vm0, %v513_v12  ;;  %v255_v21 = vld [vmem:[%s596_s0] sm:$0xf] (!%p222_p7)  ;;  %p250_p8 = scmp.lt.s32.totalorder (!%p222_p7), %s414_s15, 3 }
  0x1f   : > { %s454_s28 = smul.u32 (!%p222_p7), 48, %s228_s27  ;;  %482 = vset.pattern.permute.xlu0 (!%p222_p7), %v515_v14 }
  0x20   : > { %271 = vperm.xlu0 (!%p222_p7), %482, %v268_v13  }
  0x21   : > { %s230_s4 = scalar_lea.vmem (!%p222_p7), [#allocation2], %s454_s28 }
  0x22   : > { %v483_v15 = vld [vmem:[%s230_s4] sm:$0xff] (!%p222_p7)   ;;  %v484_v16 = vld [vmem:[%s230_s4 + $0x8] sm:$0xff] (!%p222_p7)   ;;  %v485_v17 = vld [vmem:[%s230_s4 + $0x10] sm:$0xff] (!%p222_p7)  }
  0x23   : > { %438 = vmatpush3.bf16.msra.mxu0 (!%p222_p7), %v483_v15  ;;  %v486_v18 = vld [vmem:[%s230_s4 + $0x18] sm:$0xff] (!%p222_p7)   ;;  %v487_v19 = vld [vmem:[%s230_s4 + $0x20] sm:$0xff] (!%p222_p7)   ;;  %v488_v20 = vld [vmem:[%s230_s4 + $0x28] sm:$0xff] (!%p222_p7)  }
  0x24   : > { %439 = vmatprep.subr.bf16.mxu0 (!%p222_p7), %v513_v12 }
  0x25   : > { %s604_s15 = smov (!%p250_p8, %s414_s15), 3 }
  0x26   : > { %s420_s7 = sshll.u32 %s604_s15, 3 }
  0x27   : > { %440 = vmatpush3.bf16.msra.mxu0 %v484_v16  ;;  %s253_s10 = scalar_lea.vmem %s599_s3, %s420_s7 }
  0x28   : > { %441 = vmatprep.subr.bf16.mxu0 %v513_v12 }
  0x2b   : > { %442 = vmatpush3.bf16.msra.mxu0 %v485_v17 }
  0x2c   : > { %443 = vmatprep.subr.bf16.mxu0 %v513_v12 }
  0x2f   : > { %444 = vmatpush3.bf16.msra.mxu0 %v486_v18 }
  0x30   : > { %445 = vmatprep.subr.bf16.mxu0 %v513_v12 }
  0x33   : > { %446 = vmatpush3.bf16.msra.mxu0 %v487_v19 }
  0x34   : > { %447 = vmatprep.subr.bf16.mxu0 %v513_v12 }
  0x37   : > { %448 = vmatpush3.bf16.msra.mxu0 %v488_v20 }
  0x3a   : > { %450 = vmatmul.mubr.msk.bf16.vlgmr.msra.gmra.mrb[0].mxu0 %vm310_vm1, %v255_v21 }
  0x9f   : > { %v272_v22 = vpop.permute.xlu0 %271 }
 0x10d   : > { %v348_v23 = vpop.f32.mrb[0].mxu0 }
 0x10e   : > { %v349_v24 = vadd.f32 %v348_v23, %v272_v22  ;;  %v451_v25 = vpop.f32.mrb[1].mxu0 }
 0x10f   : > { %v351_v26 = vpop.f32.mrb[2].mxu0 }
 0x110   : > { %354 = vst [vmem:[%s253_s10] sm:$0xff] %v349_v24  ;;  %v452_v27 = vpop.f32.mrb[3].mxu0 }
 0x111 PF: > { %p10_p9 = scmp.ge.s32.totalorder %s553_s16, 6   ;;  %s600_s12 = smov %s507_s13 }
 0x112   : > { %s601_s13 = smov %s562_s19  ;;  %s602_s14 = smov %s553_s16 }
 0x113   :  { %12 = sbr.rel (!%p10_p9) target bundleno = 2 (0x2), region = 108 }

</bundles_post_ra>
